<compile_context>
chip_gen: v5e
topology: v5e:2x2
jax: 0.10.0
libtpu: 0.0.40
codegen_flags: <defaults>
</compile_context>

<pallas_src>
import functools

import jax
import jax.numpy as jnp
from jax.experimental import pallas as pl
from jax.experimental.pallas import tpu as pltpu


# ----------------------------------------------------------------------------
# helpers
# ----------------------------------------------------------------------------
def _pick_tile(dim, preferred):
    """Largest of `preferred` that exactly divides `dim`; else the full dim.

    `preferred` values are chosen as multiples of (8, 128) so tiles always satisfy
    the TPU sublane/lane divisibility constraint; the fallback (full dim) is always
    legal. Tile sizes keep double-buffered footprints well under the v7x 64 MiB VMEM.
    """
    if dim <= preferred:
        return dim
    if dim % preferred == 0:
        return preferred
    return dim


# ----------------------------------------------------------------------------
# tiled linear (+ optional relu)
# ----------------------------------------------------------------------------
def _linear_kernel(x_ref, w_ref, b_ref, o_ref, acc_ref, *, activation):
    k = pl.program_id(2)

    @pl.when(k == 0)
    def _():
        acc_ref[...] = jnp.zeros_like(acc_ref)

    acc_ref[...] += jnp.dot(x_ref[...], w_ref[...],
                            preferred_element_type=jnp.float32)

    @pl.when(k == pl.num_programs(2) - 1)
    def _():
        y = acc_ref[...] + b_ref[...].astype(jnp.float32)
        if activation == "relu":
            y = jnp.maximum(y, 0.0)
        o_ref[...] = y.astype(o_ref.dtype)


def linear(x, w, b, activation=None, *, tm=256, tn=512, tk=512):
    """o = act(x @ w + b); x:(M,K), w:(K,N) (pre-transposed), b:(N,)."""
    M, K = x.shape
    _, N = w.shape
    tm = _pick_tile(M, tm)
    tn = _pick_tile(N, tn)
    tk = _pick_tile(K, tk)
    grid = (M // tm, N // tn, K // tk)
    return pl.pallas_call(
        functools.partial(_linear_kernel, activation=activation),
        out_shape=jax.ShapeDtypeStruct((M, N), x.dtype),
        grid_spec=pltpu.PrefetchScalarGridSpec(
            num_scalar_prefetch=0,
            grid=grid,
            in_specs=[
                pl.BlockSpec((tm, tk), lambda i, j, k: (i, k)),
                pl.BlockSpec((tk, tn), lambda i, j, k: (k, j)),
                pl.BlockSpec((1, tn), lambda i, j, k: (0, j)),
            ],
            out_specs=pl.BlockSpec((tm, tn), lambda i, j, k: (i, j)),
            scratch_shapes=[pltpu.VMEM((tm, tn), jnp.float32)],
        ),
        compiler_params=pltpu.CompilerParams(
            dimension_semantics=("parallel", "parallel", "arbitrary")),
    )(x, w, b.reshape(1, N))


# ----------------------------------------------------------------------------
# tiled linear + residual add + LayerNorm fused epilogue
# ----------------------------------------------------------------------------
def _linear_res_ln_kernel(x_ref, w_ref, b_ref, r_ref, g_ref, beta_ref, o_ref,
                          acc_ref, *, eps):
    k = pl.program_id(1)

    @pl.when(k == 0)
    def _():
        acc_ref[...] = jnp.zeros_like(acc_ref)

    acc_ref[...] += jnp.dot(x_ref[...], w_ref[...],
                            preferred_element_type=jnp.float32)

    @pl.when(k == pl.num_programs(1) - 1)
    def _():
        z = acc_ref[...] + b_ref[...].astype(jnp.float32) \
            + r_ref[...].astype(jnp.float32)
        mu = jnp.mean(z, axis=-1, keepdims=True)
        d = z - mu
        var = jnp.mean(d * d, axis=-1, keepdims=True)   # biased, like torch LN
        y = d * jax.lax.rsqrt(var + eps)
        o_ref[...] = (y * g_ref[...] + beta_ref[...]).astype(o_ref.dtype)


def linear_residual_layernorm(x, w, b, residual, gamma, beta, *, eps=1e-5,
                              tm=256, tk=512):
    """o = LayerNorm(residual + x @ w + b); LN over full N rows, so N is untiled."""
    M, K = x.shape
    _, N = w.shape
    tm = _pick_tile(M, tm)
    tk = _pick_tile(K, tk)
    grid = (M // tm, K // tk)
    return pl.pallas_call(
        functools.partial(_linear_res_ln_kernel, eps=eps),
        out_shape=jax.ShapeDtypeStruct((M, N), x.dtype),
        grid_spec=pltpu.PrefetchScalarGridSpec(
            num_scalar_prefetch=0,
            grid=grid,
            in_specs=[
                pl.BlockSpec((tm, tk), lambda i, k: (i, k)),
                pl.BlockSpec((tk, N), lambda i, k: (k, 0)),
                pl.BlockSpec((1, N), lambda i, k: (0, 0)),
                pl.BlockSpec((tm, N), lambda i, k: (i, 0)),
                pl.BlockSpec((1, N), lambda i, k: (0, 0)),
                pl.BlockSpec((1, N), lambda i, k: (0, 0)),
            ],
            out_specs=pl.BlockSpec((tm, N), lambda i, k: (i, 0)),
            scratch_shapes=[pltpu.VMEM((tm, N), jnp.float32)],
        ),
        compiler_params=pltpu.CompilerParams(
            dimension_semantics=("parallel", "arbitrary")),
    )(x, w, b.reshape(1, N), residual, gamma.reshape(1, N), beta.reshape(1, N))


# ----------------------------------------------------------------------------
# multi-head self-attention: all heads per step, head-averaged weights in-kernel
# ----------------------------------------------------------------------------
def _mha_kernel(q_ref, k_ref, v_ref, o_ref, w_ref, *, num_heads, head_dim):
    # q: (tq, E), k/v: (S, E); heads packed along lanes. Scale already folded into
    # the Q columns of the in-projection, so no per-element multiply here.
    q = q_ref[0].astype(jnp.float32)
    k = k_ref[0].astype(jnp.float32)
    v = v_ref[0].astype(jnp.float32)

    ctx_parts = []
    w_sum = None
    for h in range(num_heads):
        lo = h * head_dim
        qh = q[:, lo:lo + head_dim]
        kh = k[:, lo:lo + head_dim]
        vh = v[:, lo:lo + head_dim]
        # q . k^T without materializing a transpose: contract the last dims.
        s = jax.lax.dot_general(qh, kh, (((1,), (1,)), ((), ())),
                                preferred_element_type=jnp.float32)   # (tq, S)
        m = jnp.max(s, axis=-1, keepdims=True)
        e = jnp.exp(s - m)
        denom = jnp.sum(e, axis=-1, keepdims=True)
        p = e * pl.reciprocal(denom, approx=True)                      # EUP slot
        ctx_parts.append(jnp.dot(p, vh, preferred_element_type=jnp.float32))
        w_sum = p if w_sum is None else w_sum + p

    # single lane-dense (tq, E) store; weights averaged over heads in-kernel.
    o_ref[0] = jnp.concatenate(ctx_parts, axis=-1).astype(o_ref.dtype)
    w_ref[0] = (w_sum * (1.0 / num_heads)).astype(w_ref.dtype)


def multihead_attention(qkv, num_heads, *, tq=256):
    """qkv: (B, S, 3E) with [q|k|v] packed on the last axis.

    Returns (context (B, S, E), head-averaged weights (B, S, S)).
    """
    B, S, E3 = qkv.shape
    E = E3 // 3
    Dh = E // num_heads
    tq = _pick_tile(S, tq)
    grid = (B, S // tq)
    return pl.pallas_call(
        functools.partial(_mha_kernel, num_heads=num_heads, head_dim=Dh),
        out_shape=(
            jax.ShapeDtypeStruct((B, S, E), qkv.dtype),
            jax.ShapeDtypeStruct((B, S, S), jnp.float32),
        ),
        grid_spec=pltpu.PrefetchScalarGridSpec(
            num_scalar_prefetch=0,
            grid=grid,
            in_specs=[
                # column-block 0 / 1 / 2 of the packed qkv buffer (= q / k / v)
                pl.BlockSpec((1, tq, E), lambda b, i: (b, i, 0)),
                pl.BlockSpec((1, S, E), lambda b, i: (b, 0, 1)),
                pl.BlockSpec((1, S, E), lambda b, i: (b, 0, 2)),
            ],
            out_specs=(
                pl.BlockSpec((1, tq, E), lambda b, i: (b, i, 0)),
                pl.BlockSpec((1, tq, S), lambda b, i: (b, i, 0)),
            ),
        ),
        compiler_params=pltpu.CompilerParams(
            dimension_semantics=("parallel", "parallel")),
    )(qkv, qkv, qkv)


# ----------------------------------------------------------------------------
# parameter preparation (one-time, outside the forward)
# ----------------------------------------------------------------------------
def prepare_params(tp, num_heads):
    """Pre-transpose weights to (K, N) and fold 1/sqrt(Dh) into the Q projection."""
    E = tp["out_proj_w"].shape[0]
    Dh = E // num_heads
    scale = float(Dh) ** -0.5
    dt = tp["in_proj_w"].dtype
    row_scale = jnp.concatenate(
        [jnp.full((E,), scale, dtype=dt), jnp.ones((2 * E,), dtype=dt)])
    return {
        "w_qkv": (tp["in_proj_w"] * row_scale[:, None]).T,   # (E, 3E)
        "b_qkv": tp["in_proj_b"] * row_scale,
        "w_out": tp["out_proj_w"].T,                         # (E, E)
        "b_out": tp["out_proj_b"],
        "w_fc1": tp["fc1_w"].T,                              # (E, HID)
        "b_fc1": tp["fc1_b"],
        "w_fc2": tp["fc2_w"].T,                              # (HID, E)
        "b_fc2": tp["fc2_b"],
        "ln0_g": tp["ln0_g"], "ln0_b": tp["ln0_b"],
        "ln1_g": tp["ln1_g"], "ln1_b": tp["ln1_b"],
    }


# ----------------------------------------------------------------------------
# TransformerBlock forward (post-norm, normalize_before=False, eval mode)
# ----------------------------------------------------------------------------
def transformer_block_forward(x, params, num_heads):
    """x: (S, B, E) float32. Returns (out (S,B,E), attn_weights (B,S,S))."""
    S, B, E = x.shape
    M = B * S

    # Single layout change to batch-major; everything downstream stays (B,S,*).
    xb = jnp.transpose(x, (1, 0, 2))          # (B, S, E)
    x2d = xb.reshape(M, E)

    # --- self attention -----------------------------------------------------
    qkv = linear(x2d, params["w_qkv"], params["b_qkv"])        # (M, 3E)
    qkv = qkv.reshape(B, S, 3 * E)

    ctx, weights = multihead_attention(qkv, num_heads)         # (B,S,E), (B,S,S)
    ctx2d = ctx.reshape(M, E)

    # out_proj + dropout(identity) + residual + LayerNorm0, fused
    x2d = linear_residual_layernorm(ctx2d, params["w_out"], params["b_out"],
                                    x2d, params["ln0_g"], params["ln0_b"])

    # --- feed-forward ---------------------------------------------------------
    h = linear(x2d, params["w_fc1"], params["b_fc1"], activation="relu")
    # fc2 + dropout(identity) + residual + LayerNorm1, fused
    out2d = linear_residual_layernorm(h, params["w_fc2"], params["b_fc2"],
                                      x2d, params["ln1_g"], params["ln1_b"])

    out = jnp.transpose(out2d.reshape(B, S, E), (1, 0, 2))     # back to (S, B, E)
    return out, weights


# ----------------------------------------------------------------------------
# Pure-JAX reference (torch-layout params) for sanity checking the kernels
# ----------------------------------------------------------------------------
def reference_forward(x, tp, num_heads):
    S, B, E = x.shape
    H = num_heads
    Dh = E // H
    scale = float(Dh) ** -0.5

    def ln(v, g, b, eps=1e-5):
        mu = v.mean(-1, keepdims=True)
        var = ((v - mu) ** 2).mean(-1, keepdims=True)
        return (v - mu) / jnp.sqrt(var + eps) * g + b

    x2d = x.reshape(S * B, E)
    qkv = x2d @ tp["in_proj_w"].T + tp["in_proj_b"]
    q2d, k2d, v2d = qkv[:, :E], qkv[:, E:2 * E], qkv[:, 2 * E:]
    heads = lambda t: t.reshape(S, B, H, Dh).transpose(1, 2, 0, 3).reshape(B * H, S, Dh)
    qh, kh, vh = heads(q2d), heads(k2d), heads(v2d)
    s = jnp.einsum("nsd,ntd->nst", qh * scale, kh)
    p = jax.nn.softmax(s, axis=-1)
    o = jnp.einsum("nst,ntd->nsd", p, vh)
    o = o.reshape(B, H, S, Dh).transpose(2, 0, 1, 3).reshape(S * B, E)
    o = o @ tp["out_proj_w"].T + tp["out_proj_b"]
    x2d = ln(x2d + o, tp["ln0_g"], tp["ln0_b"])
    h = jnp.maximum(x2d @ tp["fc1_w"].T + tp["fc1_b"], 0.0)
    y = h @ tp["fc2_w"].T + tp["fc2_b"]
    out = ln(x2d + y, tp["ln1_g"], tp["ln1_b"])
    return out.reshape(S, B, E), p.reshape(B, H, S, S).mean(axis=1)


# ----------------------------------------------------------------------------
if __name__ == "__main__":
    S, B, E, H = 8, 2, 128, 4          # seq, batch, embed, heads (Dh = 32)
    HID = E                            # ffn_embed_dim defaults to in_features

    key = jax.random.PRNGKey(0)
    ks = jax.random.split(key, 8)
    init = lambda k, shape: (0.05 * jax.random.normal(k, shape)).astype(jnp.float32)

    torch_params = {
        "in_proj_w": init(ks[0], (3 * E, E)),
        "in_proj_b": init(ks[1], (3 * E,)),
        "out_proj_w": init(ks[2], (E, E)),
        "out_proj_b": init(ks[3], (E,)),
        "fc1_w": init(ks[4], (HID, E)),
        "fc1_b": init(ks[5], (HID,)),
        "fc2_w": init(ks[6], (E, HID)),
        "fc2_b": init(ks[7], (E,)),
        "ln0_g": jnp.ones((E,), jnp.float32),
        "ln0_b": jnp.zeros((E,), jnp.float32),
        "ln1_g": jnp.ones((E,), jnp.float32),
        "ln1_b": jnp.zeros((E,), jnp.float32),
    }

    x = jax.random.normal(jax.random.PRNGKey(42), (S, B, E), dtype=jnp.float32)

    params = prepare_params(torch_params, H)
    fwd = jax.jit(transformer_block_forward, static_argnums=(2,))

    out, weights = fwd(x, params, H)
    out = jax.block_until_ready(out)
    weights = jax.block_until_ready(weights)

    ref_out, ref_w = reference_forward(x, torch_params, H)
    assert out.shape == (S, B, E) and weights.shape == (B, S, S)
    # Tolerances relaxed slightly vs. exact f32 because the softmax denominator uses
    # pl.reciprocal(approx=True) (EUP approximate reciprocal).
    assert jnp.allclose(out, ref_out, atol=5e-3, rtol=5e-3), \
        float(jnp.max(jnp.abs(out - ref_out)))
    assert jnp.allclose(weights, ref_w, atol=5e-3, rtol=5e-3), \
        float(jnp.max(jnp.abs(weights - ref_w)))

    print("KERNEL_OK")
</pallas_src>

<mosaic_0001>
module attributes {stable_mosaic.version = 11 : i64} {
  func.func @_linear_kernel(%arg0: i32, %arg1: i32, %arg2: i32, %arg3: memref<16x128xf32, #tpu.memory_space<vmem>>, %arg4: memref<128x128xf32, #tpu.memory_space<vmem>>, %arg5: memref<1x128xf32, #tpu.memory_space<vmem>>, %arg6: memref<16x128xf32, #tpu.memory_space<vmem>>, %arg7: memref<16x128xf32, #tpu.memory_space<vmem>>) attributes {dimension_semantics = [#tpu.dimension_semantics<parallel>, #tpu.dimension_semantics<parallel>, #tpu.dimension_semantics<arbitrary>], iteration_bounds = array<i64: 1, 1, 1>, scalar_prefetch = 0 : i64, scratch_operands = 1 : i64, tpu.core_type = #tpu.core_type<tc>, window_params = [{transform_indices = @transform_0, window_bounds = array<i64: 16, 128>}, {transform_indices = @transform_1, window_bounds = array<i64: 128, 128>}, {transform_indices = @transform_2, window_bounds = array<i64: 1, 128>}, {transform_indices = @transform_3, window_bounds = array<i64: 16, 128>}]} {
    %c0_i32 = arith.constant 0 : i32
    %0 = arith.cmpi eq, %arg2, %c0_i32 : i32
    %1 = arith.extui %0 : i1 to i32
    %c0_i32_0 = arith.constant 0 : i32
    %2 = arith.cmpi ne, %1, %c0_i32_0 : i32
    scf.if %2 {
      %cst_10 = arith.constant 0.000000e+00 : f32
      %12 = vector.broadcast %cst_10 : f32 to vector<16x128xf32>
      %c0_11 = arith.constant 0 : index
      %c0_12 = arith.constant 0 : index
      %13 = vector.load %arg7[%c0_11, %c0_12] : memref<16x128xf32, #tpu.memory_space<vmem>>, vector<16x128xf32>
      tpu.vector_store %arg7[%c0_11, %c0_12], %12 {strides = array<i32>} : memref<16x128xf32, #tpu.memory_space<vmem>>, vector<16x128xf32>,
    } else {
    }
    %c0 = arith.constant 0 : index
    %c0_1 = arith.constant 0 : index
    %3 = vector.load %arg7[%c0, %c0_1] : memref<16x128xf32, #tpu.memory_space<vmem>>, vector<16x128xf32>
    %c0_2 = arith.constant 0 : index
    %c0_3 = arith.constant 0 : index
    %4 = vector.load %arg3[%c0_2, %c0_3] : memref<16x128xf32, #tpu.memory_space<vmem>>, vector<16x128xf32>
    %c0_4 = arith.constant 0 : index
    %c0_5 = arith.constant 0 : index
    %5 = vector.load %arg4[%c0_4, %c0_5] : memref<128x128xf32, #tpu.memory_space<vmem>>, vector<128x128xf32>
    %cst = arith.constant dense<0.000000e+00> : vector<16x128xf32>
    %6 = tpu.matmul %4, %5, %cst {dimension_numbers = #tpu.dot_dimension_numbers<[1], [0], [0], [1], [0, 0, 1, 1], [], []>} : vector<16x128xf32>, vector<128x128xf32>, vector<16x128xf32> -> vector<16x128xf32>
    %7 = arith.addf %3, %6 : vector<16x128xf32>
    %c0_6 = arith.constant 0 : index
    %c0_7 = arith.constant 0 : index
    %8 = vector.load %arg7[%c0_6, %c0_7] : memref<16x128xf32, #tpu.memory_space<vmem>>, vector<16x128xf32>
    tpu.vector_store %arg7[%c0_6, %c0_7], %7 {strides = array<i32>} : memref<16x128xf32, #tpu.memory_space<vmem>>, vector<16x128xf32>,
    %c0_i32_8 = arith.constant 0 : i32
    %9 = arith.cmpi eq, %arg2, %c0_i32_8 : i32
    %10 = arith.extui %9 : i1 to i32
    %c0_i32_9 = arith.constant 0 : i32
    %11 = arith.cmpi ne, %10, %c0_i32_9 : i32
    scf.if %11 {
      %c0_10 = arith.constant 0 : index
      %c0_11 = arith.constant 0 : index
      %12 = vector.load %arg7[%c0_10, %c0_11] : memref<16x128xf32, #tpu.memory_space<vmem>>, vector<16x128xf32>
      %c0_12 = arith.constant 0 : index
      %c0_13 = arith.constant 0 : index
      %13 = vector.load %arg5[%c0_12, %c0_13] : memref<1x128xf32, #tpu.memory_space<vmem>>, vector<1x128xf32>
      %14 = vector.broadcast %13 : vector<1x128xf32> to vector<16x128xf32>
      %15 = arith.addf %12, %14 : vector<16x128xf32>
      %cst_14 = arith.constant 0.000000e+00 : f32
      %16 = vector.broadcast %cst_14 : f32 to vector<16x128xf32>
      %17 = arith.maximumf %15, %16 : vector<16x128xf32>
      %c0_15 = arith.constant 0 : index
      %c0_16 = arith.constant 0 : index
      %18 = vector.load %arg6[%c0_15, %c0_16] : memref<16x128xf32, #tpu.memory_space<vmem>>, vector<16x128xf32>
      tpu.vector_store %arg6[%c0_15, %c0_16], %17 {strides = array<i32>} : memref<16x128xf32, #tpu.memory_space<vmem>>, vector<16x128xf32>,
    } else {
    }
    return
  }
  func.func @transform_0(%arg0: i32, %arg1: i32, %arg2: i32) -> (i32, i32) {
    %c0_i32 = arith.constant 0 : i32
    return %arg0, %arg2 : i32, i32
  }
  func.func @transform_1(%arg0: i32, %arg1: i32, %arg2: i32) -> (i32, i32) {
    %c0_i32 = arith.constant 0 : i32
    return %arg2, %arg1 : i32, i32
  }
  func.func @transform_2(%arg0: i32, %arg1: i32, %arg2: i32) -> (i32, i32) {
    %c0_i32 = arith.constant 0 : i32
    %c0_i32_0 = arith.constant 0 : i32
    return %c0_i32, %arg1 : i32, i32
  }
  func.func @transform_3(%arg0: i32, %arg1: i32, %arg2: i32) -> (i32, i32) {
    %c0_i32 = arith.constant 0 : i32
    return %arg0, %arg1 : i32, i32
  }
}

module attributes {stable_mosaic.version = 11 : i64} {
  func.func @_linear_kernel(%arg0: i32, %arg1: i32, %arg2: i32, %arg3: memref<16x128xf32, #tpu.memory_space<vmem>>, %arg4: memref<128x384xf32, #tpu.memory_space<vmem>>, %arg5: memref<1x384xf32, #tpu.memory_space<vmem>>, %arg6: memref<16x384xf32, #tpu.memory_space<vmem>>, %arg7: memref<16x384xf32, #tpu.memory_space<vmem>>) attributes {dimension_semantics = [#tpu.dimension_semantics<parallel>, #tpu.dimension_semantics<parallel>, #tpu.dimension_semantics<arbitrary>], iteration_bounds = array<i64: 1, 1, 1>, scalar_prefetch = 0 : i64, scratch_operands = 1 : i64, tpu.core_type = #tpu.core_type<tc>, window_params = [{transform_indices = @transform_0, window_bounds = array<i64: 16, 128>}, {transform_indices = @transform_1, window_bounds = array<i64: 128, 384>}, {transform_indices = @transform_2, window_bounds = array<i64: 1, 384>}, {transform_indices = @transform_3, window_bounds = array<i64: 16, 384>}]} {
    %c0_i32 = arith.constant 0 : i32
    %0 = arith.cmpi eq, %arg2, %c0_i32 : i32
    %1 = arith.extui %0 : i1 to i32
    %c0_i32_0 = arith.constant 0 : i32
    %2 = arith.cmpi ne, %1, %c0_i32_0 : i32
    scf.if %2 {
      %cst_10 = arith.constant 0.000000e+00 : f32
      %12 = vector.broadcast %cst_10 : f32 to vector<16x384xf32>
      %c0_11 = arith.constant 0 : index
      %c0_12 = arith.constant 0 : index
      %13 = vector.load %arg7[%c0_11, %c0_12] : memref<16x384xf32, #tpu.memory_space<vmem>>, vector<16x384xf32>
      tpu.vector_store %arg7[%c0_11, %c0_12], %12 {strides = array<i32>} : memref<16x384xf32, #tpu.memory_space<vmem>>, vector<16x384xf32>,
    } else {
    }
    %c0 = arith.constant 0 : index
    %c0_1 = arith.constant 0 : index
    %3 = vector.load %arg7[%c0, %c0_1] : memref<16x384xf32, #tpu.memory_space<vmem>>, vector<16x384xf32>
    %c0_2 = arith.constant 0 : index
    %c0_3 = arith.constant 0 : index
    %4 = vector.load %arg3[%c0_2, %c0_3] : memref<16x128xf32, #tpu.memory_space<vmem>>, vector<16x128xf32>
    %c0_4 = arith.constant 0 : index
    %c0_5 = arith.constant 0 : index
    %5 = vector.load %arg4[%c0_4, %c0_5] : memref<128x384xf32, #tpu.memory_space<vmem>>, vector<128x384xf32>
    %cst = arith.constant dense<0.000000e+00> : vector<16x384xf32>
    %6 = tpu.matmul %4, %5, %cst {dimension_numbers = #tpu.dot_dimension_numbers<[1], [0], [0], [1], [0, 0, 1, 1], [], []>} : vector<16x128xf32>, vector<128x384xf32>, vector<16x384xf32> -> vector<16x384xf32>
    %7 = arith.addf %3, %6 : vector<16x384xf32>
    %c0_6 = arith.constant 0 : index
    %c0_7 = arith.constant 0 : index
    %8 = vector.load %arg7[%c0_6, %c0_7] : memref<16x384xf32, #tpu.memory_space<vmem>>, vector<16x384xf32>
    tpu.vector_store %arg7[%c0_6, %c0_7], %7 {strides = array<i32>} : memref<16x384xf32, #tpu.memory_space<vmem>>, vector<16x384xf32>,
    %c0_i32_8 = arith.constant 0 : i32
    %9 = arith.cmpi eq, %arg2, %c0_i32_8 : i32
    %10 = arith.extui %9 : i1 to i32
    %c0_i32_9 = arith.constant 0 : i32
    %11 = arith.cmpi ne, %10, %c0_i32_9 : i32
    scf.if %11 {
      %c0_10 = arith.constant 0 : index
      %c0_11 = arith.constant 0 : index
      %12 = vector.load %arg7[%c0_10, %c0_11] : memref<16x384xf32, #tpu.memory_space<vmem>>, vector<16x384xf32>
      %c0_12 = arith.constant 0 : index
      %c0_13 = arith.constant 0 : index
      %13 = vector.load %arg5[%c0_12, %c0_13] : memref<1x384xf32, #tpu.memory_space<vmem>>, vector<1x384xf32>
      %14 = vector.broadcast %13 : vector<1x384xf32> to vector<16x384xf32>
      %15 = arith.addf %12, %14 : vector<16x384xf32>
      %c0_14 = arith.constant 0 : index
      %c0_15 = arith.constant 0 : index
      %16 = vector.load %arg6[%c0_14, %c0_15] : memref<16x384xf32, #tpu.memory_space<vmem>>, vector<16x384xf32>
      tpu.vector_store %arg6[%c0_14, %c0_15], %15 {strides = array<i32>} : memref<16x384xf32, #tpu.memory_space<vmem>>, vector<16x384xf32>,
    } else {
    }
    return
  }
  func.func @transform_0(%arg0: i32, %arg1: i32, %arg2: i32) -> (i32, i32) {
    %c0_i32 = arith.constant 0 : i32
    return %arg0, %arg2 : i32, i32
  }
  func.func @transform_1(%arg0: i32, %arg1: i32, %arg2: i32) -> (i32, i32) {
    %c0_i32 = arith.constant 0 : i32
    return %arg2, %arg1 : i32, i32
  }
  func.func @transform_2(%arg0: i32, %arg1: i32, %arg2: i32) -> (i32, i32) {
    %c0_i32 = arith.constant 0 : i32
    %c0_i32_0 = arith.constant 0 : i32
    return %c0_i32, %arg1 : i32, i32
  }
  func.func @transform_3(%arg0: i32, %arg1: i32, %arg2: i32) -> (i32, i32) {
    %c0_i32 = arith.constant 0 : i32
    return %arg0, %arg1 : i32, i32
  }
}

module attributes {stable_mosaic.version = 11 : i64} {
  func.func @_mha_kernel(%arg0: i32, %arg1: i32, %arg2: memref<1x8x128xf32, #tpu.memory_space<vmem>>, %arg3: memref<1x8x128xf32, #tpu.memory_space<vmem>>, %arg4: memref<1x8x128xf32, #tpu.memory_space<vmem>>, %arg5: memref<1x8x128xf32, #tpu.memory_space<vmem>>, %arg6: memref<1x8x8xf32, #tpu.memory_space<vmem>>) attributes {dimension_semantics = [#tpu.dimension_semantics<parallel>, #tpu.dimension_semantics<parallel>], iteration_bounds = array<i64: 2, 1>, scalar_prefetch = 0 : i64, scratch_operands = 0 : i64, tpu.core_type = #tpu.core_type<tc>, window_params = [{transform_indices = @transform_0, window_bounds = array<i64: 1, 8, 128>}, {transform_indices = @transform_1, window_bounds = array<i64: 1, 8, 128>}, {transform_indices = @transform_2, window_bounds = array<i64: 1, 8, 128>}, {transform_indices = @transform_3, window_bounds = array<i64: 1, 8, 128>}, {transform_indices = @transform_4, window_bounds = array<i64: 1, 8, 8>}]} {
    %c0 = arith.constant 0 : index
    %c0_0 = arith.constant 0 : index
    %c0_1 = arith.constant 0 : index
    %0 = vector.load %arg2[%c0, %c0_0, %c0_1] : memref<1x8x128xf32, #tpu.memory_space<vmem>>, vector<1x8x128xf32>
    %1 = vector.shape_cast %0 : vector<1x8x128xf32> to vector<8x128xf32>
    %c0_2 = arith.constant 0 : index
    %c0_3 = arith.constant 0 : index
    %c0_4 = arith.constant 0 : index
    %2 = vector.load %arg3[%c0_2, %c0_3, %c0_4] : memref<1x8x128xf32, #tpu.memory_space<vmem>>, vector<1x8x128xf32>
    %3 = vector.shape_cast %2 : vector<1x8x128xf32> to vector<8x128xf32>
    %c0_5 = arith.constant 0 : index
    %c0_6 = arith.constant 0 : index
    %c0_7 = arith.constant 0 : index
    %4 = vector.load %arg4[%c0_5, %c0_6, %c0_7] : memref<1x8x128xf32, #tpu.memory_space<vmem>>, vector<1x8x128xf32>
    %5 = vector.shape_cast %4 : vector<1x8x128xf32> to vector<8x128xf32>
    %6 = vector.extract_strided_slice %1 {offsets = [0, 0], sizes = [8, 32], strides = [1, 1]} : vector<8x128xf32> to vector<8x32xf32>
    %7 = vector.extract_strided_slice %3 {offsets = [0, 0], sizes = [8, 32], strides = [1, 1]} : vector<8x128xf32> to vector<8x32xf32>
    %8 = vector.extract_strided_slice %5 {offsets = [0, 0], sizes = [8, 32], strides = [1, 1]} : vector<8x128xf32> to vector<8x32xf32>
    %cst = arith.constant dense<0.000000e+00> : vector<8x8xf32>
    %9 = tpu.matmul %6, %7, %cst {dimension_numbers = #tpu.dot_dimension_numbers<[1], [1], [0], [0], [0, 0, 1, 0], [], []>} : vector<8x32xf32>, vector<8x32xf32>, vector<8x8xf32> -> vector<8x8xf32>
    %cst_8 = arith.constant dense<0xFF800000> : vector<8xf32>
    %10 = vector.multi_reduction <maximumf>, %9, %cst_8 [1] : vector<8x8xf32> to vector<8xf32>
    %11 = vector.shape_cast %10 : vector<8xf32> to vector<8x1xf32>
    %12 = vector.broadcast %11 : vector<8x1xf32> to vector<8x8xf32>
    %13 = arith.subf %9, %12 : vector<8x8xf32>
    %14 = math.exp %13 : vector<8x8xf32>
    %cst_9 = arith.constant dense<0.000000e+00> : vector<8xf32>
    %15 = vector.multi_reduction <add>, %14, %cst_9 [1] : vector<8x8xf32> to vector<8xf32>
    %16 = vector.shape_cast %15 : vector<8xf32> to vector<8x1xf32>
    %17 = tpu.reciprocal %16 {approx = true} : vector<8x1xf32> -> vector<8x1xf32>
    %18 = vector.broadcast %17 : vector<8x1xf32> to vector<8x8xf32>
    %19 = arith.mulf %14, %18 : vector<8x8xf32>
    %cst_10 = arith.constant dense<0.000000e+00> : vector<8x32xf32>
    %20 = tpu.matmul %19, %8, %cst_10 {dimension_numbers = #tpu.dot_dimension_numbers<[1], [0], [0], [1], [0, 0, 1, 1], [], []>} : vector<8x8xf32>, vector<8x32xf32>, vector<8x32xf32> -> vector<8x32xf32>
    %21 = vector.extract_strided_slice %1 {offsets = [0, 32], sizes = [8, 32], strides = [1, 1]} : vector<8x128xf32> to vector<8x32xf32>
    %22 = vector.extract_strided_slice %3 {offsets = [0, 32], sizes = [8, 32], strides = [1, 1]} : vector<8x128xf32> to vector<8x32xf32>
    %23 = vector.extract_strided_slice %5 {offsets = [0, 32], sizes = [8, 32], strides = [1, 1]} : vector<8x128xf32> to vector<8x32xf32>
    %cst_11 = arith.constant dense<0.000000e+00> : vector<8x8xf32>
    %24 = tpu.matmul %21, %22, %cst_11 {dimension_numbers = #tpu.dot_dimension_numbers<[1], [1], [0], [0], [0, 0, 1, 0], [], []>} : vector<8x32xf32>, vector<8x32xf32>, vector<8x8xf32> -> vector<8x8xf32>
    %cst_12 = arith.constant dense<0xFF800000> : vector<8xf32>
    %25 = vector.multi_reduction <maximumf>, %24, %cst_12 [1] : vector<8x8xf32> to vector<8xf32>
    %26 = vector.shape_cast %25 : vector<8xf32> to vector<8x1xf32>
    %27 = vector.broadcast %26 : vector<8x1xf32> to vector<8x8xf32>
    %28 = arith.subf %24, %27 : vector<8x8xf32>
    %29 = math.exp %28 : vector<8x8xf32>
    %cst_13 = arith.constant dense<0.000000e+00> : vector<8xf32>
    %30 = vector.multi_reduction <add>, %29, %cst_13 [1] : vector<8x8xf32> to vector<8xf32>
    %31 = vector.shape_cast %30 : vector<8xf32> to vector<8x1xf32>
    %32 = tpu.reciprocal %31 {approx = true} : vector<8x1xf32> -> vector<8x1xf32>
    %33 = vector.broadcast %32 : vector<8x1xf32> to vector<8x8xf32>
    %34 = arith.mulf %29, %33 : vector<8x8xf32>
    %cst_14 = arith.constant dense<0.000000e+00> : vector<8x32xf32>
    %35 = tpu.matmul %34, %23, %cst_14 {dimension_numbers = #tpu.dot_dimension_numbers<[1], [0], [0], [1], [0, 0, 1, 1], [], []>} : vector<8x8xf32>, vector<8x32xf32>, vector<8x32xf32> -> vector<8x32xf32>
    %36 = arith.addf %19, %34 : vector<8x8xf32>
    %37 = vector.extract_strided_slice %1 {offsets = [0, 64], sizes = [8, 32], strides = [1, 1]} : vector<8x128xf32> to vector<8x32xf32>
    %38 = vector.extract_strided_slice %3 {offsets = [0, 64], sizes = [8, 32], strides = [1, 1]} : vector<8x128xf32> to vector<8x32xf32>
    %39 = vector.extract_strided_slice %5 {offsets = [0, 64], sizes = [8, 32], strides = [1, 1]} : vector<8x128xf32> to vector<8x32xf32>
    %cst_15 = arith.constant dense<0.000000e+00> : vector<8x8xf32>
    %40 = tpu.matmul %37, %38, %cst_15 {dimension_numbers = #tpu.dot_dimension_numbers<[1], [1], [0], [0], [0, 0, 1, 0], [], []>} : vector<8x32xf32>, vector<8x32xf32>, vector<8x8xf32> -> vector<8x8xf32>
    %cst_16 = arith.constant dense<0xFF800000> : vector<8xf32>
    %41 = vector.multi_reduction <maximumf>, %40, %cst_16 [1] : vector<8x8xf32> to vector<8xf32>
    %42 = vector.shape_cast %41 : vector<8xf32> to vector<8x1xf32>
    %43 = vector.broadcast %42 : vector<8x1xf32> to vector<8x8xf32>
    %44 = arith.subf %40, %43 : vector<8x8xf32>
    %45 = math.exp %44 : vector<8x8xf32>
    %cst_17 = arith.constant dense<0.000000e+00> : vector<8xf32>
    %46 = vector.multi_reduction <add>, %45, %cst_17 [1] : vector<8x8xf32> to vector<8xf32>
    %47 = vector.shape_cast %46 : vector<8xf32> to vector<8x1xf32>
    %48 = tpu.reciprocal %47 {approx = true} : vector<8x1xf32> -> vector<8x1xf32>
    %49 = vector.broadcast %48 : vector<8x1xf32> to vector<8x8xf32>
    %50 = arith.mulf %45, %49 : vector<8x8xf32>
    %cst_18 = arith.constant dense<0.000000e+00> : vector<8x32xf32>
    %51 = tpu.matmul %50, %39, %cst_18 {dimension_numbers = #tpu.dot_dimension_numbers<[1], [0], [0], [1], [0, 0, 1, 1], [], []>} : vector<8x8xf32>, vector<8x32xf32>, vector<8x32xf32> -> vector<8x32xf32>
    %52 = arith.addf %36, %50 : vector<8x8xf32>
    %53 = vector.extract_strided_slice %1 {offsets = [0, 96], sizes = [8, 32], strides = [1, 1]} : vector<8x128xf32> to vector<8x32xf32>
    %54 = vector.extract_strided_slice %3 {offsets = [0, 96], sizes = [8, 32], strides = [1, 1]} : vector<8x128xf32> to vector<8x32xf32>
    %55 = vector.extract_strided_slice %5 {offsets = [0, 96], sizes = [8, 32], strides = [1, 1]} : vector<8x128xf32> to vector<8x32xf32>
    %cst_19 = arith.constant dense<0.000000e+00> : vector<8x8xf32>
    %56 = tpu.matmul %53, %54, %cst_19 {dimension_numbers = #tpu.dot_dimension_numbers<[1], [1], [0], [0], [0, 0, 1, 0], [], []>} : vector<8x32xf32>, vector<8x32xf32>, vector<8x8xf32> -> vector<8x8xf32>
    %cst_20 = arith.constant dense<0xFF800000> : vector<8xf32>
    %57 = vector.multi_reduction <maximumf>, %56, %cst_20 [1] : vector<8x8xf32> to vector<8xf32>
    %58 = vector.shape_cast %57 : vector<8xf32> to vector<8x1xf32>
    %59 = vector.broadcast %58 : vector<8x1xf32> to vector<8x8xf32>
    %60 = arith.subf %56, %59 : vector<8x8xf32>
    %61 = math.exp %60 : vector<8x8xf32>
    %cst_21 = arith.constant dense<0.000000e+00> : vector<8xf32>
    %62 = vector.multi_reduction <add>, %61, %cst_21 [1] : vector<8x8xf32> to vector<8xf32>
    %63 = vector.shape_cast %62 : vector<8xf32> to vector<8x1xf32>
    %64 = tpu.reciprocal %63 {approx = true} : vector<8x1xf32> -> vector<8x1xf32>
    %65 = vector.broadcast %64 : vector<8x1xf32> to vector<8x8xf32>
    %66 = arith.mulf %61, %65 : vector<8x8xf32>
    %cst_22 = arith.constant dense<0.000000e+00> : vector<8x32xf32>
    %67 = tpu.matmul %66, %55, %cst_22 {dimension_numbers = #tpu.dot_dimension_numbers<[1], [0], [0], [1], [0, 0, 1, 1], [], []>} : vector<8x8xf32>, vector<8x32xf32>, vector<8x32xf32> -> vector<8x32xf32>
    %68 = arith.addf %52, %66 : vector<8x8xf32>
    %69 = tpu.concatenate %20, %35, %51, %67 in 1 : vector<8x32xf32>, vector<8x32xf32>, vector<8x32xf32>, vector<8x32xf32> -> vector<8x128xf32>
    %c0_23 = arith.constant 0 : index
    %c0_24 = arith.constant 0 : index
    %c0_25 = arith.constant 0 : index
    %70 = vector.load %arg5[%c0_23, %c0_24, %c0_25] : memref<1x8x128xf32, #tpu.memory_space<vmem>>, vector<1x8x128xf32>
    %71 = vector.shape_cast %70 : vector<1x8x128xf32> to vector<8x128xf32>
    %72 = vector.shape_cast %69 : vector<8x128xf32> to vector<1x8x128xf32>
    tpu.vector_store %arg5[%c0_23, %c0_24, %c0_25], %72 {strides = array<i32>} : memref<1x8x128xf32, #tpu.memory_space<vmem>>, vector<1x8x128xf32>,
    %cst_26 = arith.constant 2.500000e-01 : f32
    %73 = vector.broadcast %cst_26 : f32 to vector<8x8xf32>
    %74 = arith.mulf %68, %73 : vector<8x8xf32>
    %c0_27 = arith.constant 0 : index
    %c0_28 = arith.constant 0 : index
    %c0_29 = arith.constant 0 : index
    %75 = vector.load %arg6[%c0_27, %c0_28, %c0_29] : memref<1x8x8xf32, #tpu.memory_space<vmem>>, vector<1x8x8xf32>
    %76 = vector.shape_cast %75 : vector<1x8x8xf32> to vector<8x8xf32>
    %77 = vector.shape_cast %74 : vector<8x8xf32> to vector<1x8x8xf32>
    tpu.vector_store %arg6[%c0_27, %c0_28, %c0_29], %77 {strides = array<i32>} : memref<1x8x8xf32, #tpu.memory_space<vmem>>, vector<1x8x8xf32>,
    return
  }
  func.func @transform_0(%arg0: i32, %arg1: i32) -> (i32, i32, i32) {
    %c0_i32 = arith.constant 0 : i32
    %c0_i32_0 = arith.constant 0 : i32
    return %arg0, %arg1, %c0_i32 : i32, i32, i32
  }
  func.func @transform_1(%arg0: i32, %arg1: i32) -> (i32, i32, i32) {
    %c0_i32 = arith.constant 0 : i32
    %c1_i32 = arith.constant 1 : i32
    %c0_i32_0 = arith.constant 0 : i32
    return %arg0, %c0_i32, %c1_i32 : i32, i32, i32
  }
  func.func @transform_2(%arg0: i32, %arg1: i32) -> (i32, i32, i32) {
    %c0_i32 = arith.constant 0 : i32
    %c2_i32 = arith.constant 2 : i32
    %c0_i32_0 = arith.constant 0 : i32
    return %arg0, %c0_i32, %c2_i32 : i32, i32, i32
  }
  func.func @transform_3(%arg0: i32, %arg1: i32) -> (i32, i32, i32) {
    %c0_i32 = arith.constant 0 : i32
    %c0_i32_0 = arith.constant 0 : i32
    return %arg0, %arg1, %c0_i32 : i32, i32, i32
  }
  func.func @transform_4(%arg0: i32, %arg1: i32) -> (i32, i32, i32) {
    %c0_i32 = arith.constant 0 : i32
    %c0_i32_0 = arith.constant 0 : i32
    return %arg0, %arg1, %c0_i32 : i32, i32, i32
  }
}

module attributes {stable_mosaic.version = 11 : i64} {
  func.func @_linear_res_ln_kernel(%arg0: i32, %arg1: i32, %arg2: memref<16x128xf32, #tpu.memory_space<vmem>>, %arg3: memref<128x128xf32, #tpu.memory_space<vmem>>, %arg4: memref<1x128xf32, #tpu.memory_space<vmem>>, %arg5: memref<16x128xf32, #tpu.memory_space<vmem>>, %arg6: memref<1x128xf32, #tpu.memory_space<vmem>>, %arg7: memref<1x128xf32, #tpu.memory_space<vmem>>, %arg8: memref<16x128xf32, #tpu.memory_space<vmem>>, %arg9: memref<16x128xf32, #tpu.memory_space<vmem>>) attributes {dimension_semantics = [#tpu.dimension_semantics<parallel>, #tpu.dimension_semantics<arbitrary>], iteration_bounds = array<i64: 1, 1>, scalar_prefetch = 0 : i64, scratch_operands = 1 : i64, tpu.core_type = #tpu.core_type<tc>, window_params = [{transform_indices = @transform_0, window_bounds = array<i64: 16, 128>}, {transform_indices = @transform_1, window_bounds = array<i64: 128, 128>}, {pipeline_mode = #tpu.pipeline_mode<synchronous>, transform_indices = @transform_2, window_bounds = array<i64: 1, 128>}, {transform_indices = @transform_3, window_bounds = array<i64: 16, 128>}, {pipeline_mode = #tpu.pipeline_mode<synchronous>, transform_indices = @transform_4, window_bounds = array<i64: 1, 128>}, {pipeline_mode = #tpu.pipeline_mode<synchronous>, transform_indices = @transform_5, window_bounds = array<i64: 1, 128>}, {transform_indices = @transform_6, window_bounds = array<i64: 16, 128>}]} {
    %c0_i32 = arith.constant 0 : i32
    %0 = arith.cmpi eq, %arg1, %c0_i32 : i32
    %1 = arith.extui %0 : i1 to i32
    %c0_i32_0 = arith.constant 0 : i32
    %2 = arith.cmpi ne, %1, %c0_i32_0 : i32
    scf.if %2 {
      %cst_10 = arith.constant 0.000000e+00 : f32
      %12 = vector.broadcast %cst_10 : f32 to vector<16x128xf32>
      %c0_11 = arith.constant 0 : index
      %c0_12 = arith.constant 0 : index
      %13 = vector.load %arg9[%c0_11, %c0_12] : memref<16x128xf32, #tpu.memory_space<vmem>>, vector<16x128xf32>
      tpu.vector_store %arg9[%c0_11, %c0_12], %12 {strides = array<i32>} : memref<16x128xf32, #tpu.memory_space<vmem>>, vector<16x128xf32>,
    } else {
    }
    %c0 = arith.constant 0 : index
    %c0_1 = arith.constant 0 : index
    %3 = vector.load %arg9[%c0, %c0_1] : memref<16x128xf32, #tpu.memory_space<vmem>>, vector<16x128xf32>
    %c0_2 = arith.constant 0 : index
    %c0_3 = arith.constant 0 : index
    %4 = vector.load %arg2[%c0_2, %c0_3] : memref<16x128xf32, #tpu.memory_space<vmem>>, vector<16x128xf32>
    %c0_4 = arith.constant 0 : index
    %c0_5 = arith.constant 0 : index
    %5 = vector.load %arg3[%c0_4, %c0_5] : memref<128x128xf32, #tpu.memory_space<vmem>>, vector<128x128xf32>
    %cst = arith.constant dense<0.000000e+00> : vector<16x128xf32>
    %6 = tpu.matmul %4, %5, %cst {dimension_numbers = #tpu.dot_dimension_numbers<[1], [0], [0], [1], [0, 0, 1, 1], [], []>} : vector<16x128xf32>, vector<128x128xf32>, vector<16x128xf32> -> vector<16x128xf32>
    %7 = arith.addf %3, %6 : vector<16x128xf32>
    %c0_6 = arith.constant 0 : index
    %c0_7 = arith.constant 0 : index
    %8 = vector.load %arg9[%c0_6, %c0_7] : memref<16x128xf32, #tpu.memory_space<vmem>>, vector<16x128xf32>
    tpu.vector_store %arg9[%c0_6, %c0_7], %7 {strides = array<i32>} : memref<16x128xf32, #tpu.memory_space<vmem>>, vector<16x128xf32>,
    %c0_i32_8 = arith.constant 0 : i32
    %9 = arith.cmpi eq, %arg1, %c0_i32_8 : i32
    %10 = arith.extui %9 : i1 to i32
    %c0_i32_9 = arith.constant 0 : i32
    %11 = arith.cmpi ne, %10, %c0_i32_9 : i32
    scf.if %11 {
      %c0_10 = arith.constant 0 : index
      %c0_11 = arith.constant 0 : index
      %12 = vector.load %arg9[%c0_10, %c0_11] : memref<16x128xf32, #tpu.memory_space<vmem>>, vector<16x128xf32>
      %c0_12 = arith.constant 0 : index
      %c0_13 = arith.constant 0 : index
      %13 = vector.load %arg4[%c0_12, %c0_13] : memref<1x128xf32, #tpu.memory_space<vmem>>, vector<1x128xf32>
      %14 = vector.broadcast %13 : vector<1x128xf32> to vector<16x128xf32>
      %15 = arith.addf %12, %14 : vector<16x128xf32>
      %c0_14 = arith.constant 0 : index
      %c0_15 = arith.constant 0 : index
      %16 = vector.load %arg5[%c0_14, %c0_15] : memref<16x128xf32, #tpu.memory_space<vmem>>, vector<16x128xf32>
      %17 = arith.addf %15, %16 : vector<16x128xf32>
      %cst_16 = arith.constant dense<0.000000e+00> : vector<16xf32>
      %18 = vector.multi_reduction <add>, %17, %cst_16 [1] : vector<16x128xf32> to vector<16xf32>
      %19 = vector.shape_cast %18 : vector<16xf32> to vector<16x1xf32>
      %cst_17 = arith.constant 1.280000e+02 : f32
      %20 = vector.broadcast %cst_17 : f32 to vector<16x1xf32>
      %21 = arith.divf %19, %20 : vector<16x1xf32>
      %22 = vector.broadcast %21 : vector<16x1xf32> to vector<16x128xf32>
      %23 = arith.subf %17, %22 : vector<16x128xf32>
      %24 = arith.mulf %23, %23 : vector<16x128xf32>
      %cst_18 = arith.constant dense<0.000000e+00> : vector<16xf32>
      %25 = vector.multi_reduction <add>, %24, %cst_18 [1] : vector<16x128xf32> to vector<16xf32>
      %26 = vector.shape_cast %25 : vector<16xf32> to vector<16x1xf32>
      %cst_19 = arith.constant 1.280000e+02 : f32
      %27 = vector.broadcast %cst_19 : f32 to vector<16x1xf32>
      %28 = arith.divf %26, %27 : vector<16x1xf32>
      %cst_20 = arith.constant 9.99999974E-6 : f32
      %29 = vector.broadcast %cst_20 : f32 to vector<16x1xf32>
      %30 = arith.addf %28, %29 : vector<16x1xf32>
      %31 = math.rsqrt %30 : vector<16x1xf32>
      %32 = vector.broadcast %31 : vector<16x1xf32> to vector<16x128xf32>
      %33 = arith.mulf %23, %32 : vector<16x128xf32>
      %c0_21 = arith.constant 0 : index
      %c0_22 = arith.constant 0 : index
      %34 = vector.load %arg6[%c0_21, %c0_22] : memref<1x128xf32, #tpu.memory_space<vmem>>, vector<1x128xf32>
      %35 = vector.broadcast %34 : vector<1x128xf32> to vector<16x128xf32>
      %36 = arith.mulf %33, %35 : vector<16x128xf32>
      %c0_23 = arith.constant 0 : index
      %c0_24 = arith.constant 0 : index
      %37 = vector.load %arg7[%c0_23, %c0_24] : memref<1x128xf32, #tpu.memory_space<vmem>>, vector<1x128xf32>
      %38 = vector.broadcast %37 : vector<1x128xf32> to vector<16x128xf32>
      %39 = arith.addf %36, %38 : vector<16x128xf32>
      %c0_25 = arith.constant 0 : index
      %c0_26 = arith.constant 0 : index
      %40 = vector.load %arg8[%c0_25, %c0_26] : memref<16x128xf32, #tpu.memory_space<vmem>>, vector<16x128xf32>
      tpu.vector_store %arg8[%c0_25, %c0_26], %39 {strides = array<i32>} : memref<16x128xf32, #tpu.memory_space<vmem>>, vector<16x128xf32>,
    } else {
    }
    return
  }
  func.func @transform_0(%arg0: i32, %arg1: i32) -> (i32, i32) {
    %c0_i32 = arith.constant 0 : i32
    return %arg0, %arg1 : i32, i32
  }
  func.func @transform_1(%arg0: i32, %arg1: i32) -> (i32, i32) {
    %c0_i32 = arith.constant 0 : i32
    %c0_i32_0 = arith.constant 0 : i32
    return %arg1, %c0_i32 : i32, i32
  }
  func.func @transform_2(%arg0: i32, %arg1: i32) -> (i32, i32) {
    %c0_i32 = arith.constant 0 : i32
    %c0_i32_0 = arith.constant 0 : i32
    %c0_i32_1 = arith.constant 0 : i32
    return %c0_i32, %c0_i32_0 : i32, i32
  }
  func.func @transform_3(%arg0: i32, %arg1: i32) -> (i32, i32) {
    %c0_i32 = arith.constant 0 : i32
    %c0_i32_0 = arith.constant 0 : i32
    return %arg0, %c0_i32 : i32, i32
  }
  func.func @transform_4(%arg0: i32, %arg1: i32) -> (i32, i32) {
    %c0_i32 = arith.constant 0 : i32
    %c0_i32_0 = arith.constant 0 : i32
    %c0_i32_1 = arith.constant 0 : i32
    return %c0_i32, %c0_i32_0 : i32, i32
  }
  func.func @transform_5(%arg0: i32, %arg1: i32) -> (i32, i32) {
    %c0_i32 = arith.constant 0 : i32
    %c0_i32_0 = arith.constant 0 : i32
    %c0_i32_1 = arith.constant 0 : i32
    return %c0_i32, %c0_i32_0 : i32, i32
  }
  func.func @transform_6(%arg0: i32, %arg1: i32) -> (i32, i32) {
    %c0_i32 = arith.constant 0 : i32
    %c0_i32_0 = arith.constant 0 : i32
    return %arg0, %c0_i32 : i32, i32
  }
}

</mosaic_0001>

<bundles_post_ra>
// kernel: transformer_block_forward.8
= control target key start
LH: loop header
LB: loop body
LE: loop exit
PB: predicated region body
PF: predicated region fallthrough
CT: control target
= control target key end

     0   :  { %8 = vsyncpa [#allocation4], 0  ;;  %s149_s15 = smov [#allocation3]   ;;  %s150_s17 = smov 128   ;;  %s190_s0 = inlined_call_operand.vmem [shape: f32[16,128], index: 0, kind: input, shape index: {}]   ;;  %s191_s1 = inlined_call_operand.hbm [shape: f32[128,128], index: 1, kind: input, shape index: {}]   ;;  %s192_s2 = inlined_call_operand.vmem [shape: f32[1,128], index: 2, kind: input, shape index: {}]   ;;  %s193_s3 = inlined_call_operand.vmem [shape: f32[16,128], index: 3, kind: output, shape index: {}]  }
   0x1   :  { %s15_s14 = sshll.u32 %s191_s1, 4  ;;  %s17_s16 = sshll.u32 %s149_s15, 4  ;;  %s16_s14 = int_to_ptr.hbm [resolvable:$true] %s15_s14  ;;  %s18_s16 = int_to_ptr.vmem [resolvable:$true] %s17_s16 }
   0x2   :  { %s151_s18 = smov 8  }
   0x3   :  { %23 = dma.hbm_to_vmem [thread:$0]  %s16_s14, 2048, %s18_s16, [#allocation4], %s150_s17, %s150_s17, %s151_s18  }
   0x4   :  { %147 = dma.done.wait [#allocation4], 2048  }
   0x5   :  { %148 = vsyncadd [#allocation4], 4294965248  ;;  %v55_v0 = vld [vmem:[#allocation3 + $0x78] sm:$0xff]  ;;  %v54_v1 = vld [vmem:[#allocation3 + $0x70] sm:$0xff] }
   0x6   :  { %56 = vmatpush.msra.mxu0 %v55_v0  ;;  %103 = vmatpush.msra.mxu1 %v55_v0  ;;  %v53_v2 = vld [vmem:[#allocation3 + $0x68] sm:$0xff]  ;;  %v52_v3 = vld [vmem:[#allocation3 + $0x60] sm:$0xff]  ;;  %v51_v4 = vld [vmem:[#allocation3 + $0x58] sm:$0xff] }
   0x7   :  { %v50_v5 = vld [vmem:[#allocation3 + $0x50] sm:$0xff]  ;;  %v49_v6 = vld [vmem:[#allocation3 + $0x48] sm:$0xff]  ;;  %v48_v7 = vld [vmem:[#allocation3 + $0x40] sm:$0xff] }
   0x8   :  { %57 = vmatpush.msra.mxu0 %v54_v1  ;;  %104 = vmatpush.msra.mxu1 %v54_v1  ;;  %v47_v8 = vld [vmem:[#allocation3 + $0x38] sm:$0xff]  ;;  %v46_v9 = vld [vmem:[#allocation3 + $0x30] sm:$0xff]  ;;  %v45_v10 = vld [vmem:[#allocation3 + $0x28] sm:$0xff] }
   0x9   :  { %v44_v11 = vld [vmem:[#allocation3 + $0x20] sm:$0xff]  ;;  %v43_v12 = vld [vmem:[#allocation3 + $0x18] sm:$0xff]  ;;  %v42_v13 = vld [vmem:[#allocation3 + $0x10] sm:$0xff] }
   0xa   :  { %58 = vmatpush.msra.mxu0 %v53_v2  ;;  %105 = vmatpush.msra.mxu1 %v53_v2  ;;  %v41_v14 = vld [vmem:[#allocation3 + $0x8] sm:$0xff]  ;;  %v40_v15 = vld [vmem:[#allocation3] sm:$0xff] }
   0xb   :  { %v38_v16 = vld [vmem:[%s190_s0] sm:$0xff]  ;;  %v39_v17 = vld [vmem:[%s190_s0 + $0x8] sm:$0xff] }
   0xc   :  { %59 = vmatpush.msra.mxu0 %v52_v3  ;;  %106 = vmatpush.msra.mxu1 %v52_v3  ;;  %v122_v18 = vld [vmem:[%s192_s2] ss:$0 sm:$0xff] }
   0xe   :  { %60 = vmatpush.msra.mxu0 %v51_v4  ;;  %107 = vmatpush.msra.mxu1 %v51_v4 }
  0x10   :  { %61 = vmatpush.msra.mxu0 %v50_v5  ;;  %108 = vmatpush.msra.mxu1 %v50_v5 }
  0x12   :  { %62 = vmatpush.msra.mxu0 %v49_v6  ;;  %109 = vmatpush.msra.mxu1 %v49_v6 }
  0x14   :  { %63 = vmatpush.msra.mxu0 %v48_v7  ;;  %110 = vmatpush.msra.mxu1 %v48_v7 }
  0x16   :  { %64 = vmatpush.msra.mxu0 %v47_v8  ;;  %111 = vmatpush.msra.mxu1 %v47_v8 }
  0x18   :  { %65 = vmatpush.msra.mxu0 %v46_v9  ;;  %112 = vmatpush.msra.mxu1 %v46_v9 }
  0x1a   :  { %66 = vmatpush.msra.mxu0 %v45_v10  ;;  %113 = vmatpush.msra.mxu1 %v45_v10 }
  0x1c   :  { %67 = vmatpush.msra.mxu0 %v44_v11  ;;  %114 = vmatpush.msra.mxu1 %v44_v11 }
  0x1e   :  { %68 = vmatpush.msra.mxu0 %v43_v12  ;;  %115 = vmatpush.msra.mxu1 %v43_v12 }
  0x20   :  { %69 = vmatpush.msra.mxu0 %v42_v13  ;;  %116 = vmatpush.msra.mxu1 %v42_v13 }
  0x22   :  { %70 = vmatpush.msra.mxu0 %v41_v14  ;;  %117 = vmatpush.msra.mxu1 %v41_v14 }
  0x24   :  { %71 = vmatpush.msra.mxu0 %v40_v15  ;;  %118 = vmatpush.msra.mxu1 %v40_v15 }
  0x25   :  { %72 = vmatmul.f32.vlgmr.msra.gmra.mxu0 %v38_v16  ;;  %75 = vmatmul.f32.vlgmr.msra.gmra.mxu1 %v39_v17 }
  0xa2   :  { %v73_v19 = vpop.f32.mrf.mxu0  ;;  %v76_v20 = vpop.f32.mrf.mxu1 }
  0xa3   :  { %v92_v21 = vadd.f32 %v122_v18, %v73_v19  ;;  %v93_v22 = vadd.f32 %v122_v18, %v76_v20 }
  0xa5   :  { %v94_v23 = vmax.f32 %v92_v21, 0.0  ;;  %v95_v24 = vmax.f32 %v93_v22, 0.0 }
  0xa7   :  { %96 = vst [vmem:[%s193_s3] sm:$0xff] %v94_v23 }
  0xa8   :  { %97 = vst [vmem:[%s193_s3 + $0x8] sm:$0xff] %v95_v24 }
  0xa9   :  { %102 = vsyncpa [#allocation4], 1 }

// kernel: transformer_block_forward.5
= control target key start
LH: loop header
LB: loop body
LE: loop exit
PB: predicated region body
PF: predicated region fallthrough
CT: control target
= control target key end

     0   :  { %8 = vsyncpa [#allocation4], 0  ;;  %s256_s15 = smov [#allocation3]   ;;  %s257_s17 = smov 384   ;;  %s309_s0 = inlined_call_operand.vmem [shape: f32[16,128], index: 0, kind: input, shape index: {}]   ;;  %s310_s1 = inlined_call_operand.hbm [shape: f32[128,384], index: 1, kind: input, shape index: {}]   ;;  %s311_s2 = inlined_call_operand.vmem [shape: f32[1,384], index: 2, kind: input, shape index: {}]   ;;  %s312_s3 = inlined_call_operand.vmem [shape: f32[16,384], index: 3, kind: output, shape index: {}]  }
   0x1   :  { %s15_s14 = sshll.u32 %s310_s1, 4  ;;  %s17_s16 = sshll.u32 %s256_s15, 4  ;;  %s16_s14 = int_to_ptr.hbm [resolvable:$true] %s15_s14  ;;  %s18_s16 = int_to_ptr.vmem [resolvable:$true] %s17_s16 }
   0x2   :  { %s258_s18 = smov 24  }
   0x3   :  { %23 = dma.hbm_to_vmem [thread:$0]  %s16_s14, 6144, %s18_s16, [#allocation4], %s257_s17, %s257_s17, %s258_s18  }
   0x4   :  { %254 = dma.done.wait [#allocation4], 6144  }
   0x5   :  { %255 = vsyncadd [#allocation4], 4294961152  ;;  %v95_v0 = vld [vmem:[#allocation3 + $0x178] sm:$0xff]  ;;  %v92_v1 = vld [vmem:[#allocation3 + $0x160] sm:$0xff] }
   0x6   :  { %142 = vmatpush.msra.mxu2 %v95_v0  ;;  %v94_v2 = vld [vmem:[#allocation3 + $0x170] sm:$0xff]  ;;  %v93_v3 = vld [vmem:[#allocation3 + $0x168] sm:$0xff]  ;;  %v91_v5 = vld [vmem:[#allocation3 + $0x158] sm:$0xff] }
   0x7   :  { %v89_v4 = vld [vmem:[#allocation3 + $0x148] sm:$0xff]  ;;  %119 = vmatpush.msra.mxu1 %v94_v2  ;;  %211 = vmatpush.msra.mxu3 %v93_v3  ;;  %v90_v6 = vld [vmem:[#allocation3 + $0x150] sm:$0xff]  ;;  %v88_v7 = vld [vmem:[#allocation3 + $0x140] sm:$0xff] }
   0x8   :  { %143 = vmatpush.msra.mxu2 %v92_v1  ;;  %v87_v8 = vld [vmem:[#allocation3 + $0x138] sm:$0xff]  ;;  %96 = vmatpush.msra.mxu0 %v93_v3  ;;  %v86_v9 = vld [vmem:[#allocation3 + $0x130] sm:$0xff]  ;;  %v85_v10 = vld [vmem:[#allocation3 + $0x128] sm:$0xff] }
   0x9   :  { %120 = vmatpush.msra.mxu1 %v91_v5  ;;  %212 = vmatpush.msra.mxu3 %v90_v6  ;;  %v84_v11 = vld [vmem:[#allocation3 + $0x120] sm:$0xff]  ;;  %v83_v12 = vld [vmem:[#allocation3 + $0x118] sm:$0xff]  ;;  %v82_v13 = vld [vmem:[#allocation3 + $0x110] sm:$0xff] }
   0xa   :  { %144 = vmatpush.msra.mxu2 %v89_v4  ;;  %97 = vmatpush.msra.mxu0 %v90_v6  ;;  %v81_v14 = vld [vmem:[#allocation3 + $0x108] sm:$0xff]  ;;  %v80_v15 = vld [vmem:[#allocation3 + $0x100] sm:$0xff]  ;;  %v79_v16 = vld [vmem:[#allocation3 + $0xf8] sm:$0xff] }
   0xb   :  { %121 = vmatpush.msra.mxu1 %v88_v7  ;;  %213 = vmatpush.msra.mxu3 %v87_v8  ;;  %v78_v17 = vld [vmem:[#allocation3 + $0xf0] sm:$0xff]  ;;  %v77_v18 = vld [vmem:[#allocation3 + $0xe8] sm:$0xff]  ;;  %v76_v19 = vld [vmem:[#allocation3 + $0xe0] sm:$0xff] }
   0xc   :  { %145 = vmatpush.msra.mxu2 %v86_v9  ;;  %98 = vmatpush.msra.mxu0 %v87_v8  ;;  %v75_v20 = vld [vmem:[#allocation3 + $0xd8] sm:$0xff]  ;;  %v74_v21 = vld [vmem:[#allocation3 + $0xd0] sm:$0xff]  ;;  %v73_v22 = vld [vmem:[#allocation3 + $0xc8] sm:$0xff] }
   0xd   :  { %122 = vmatpush.msra.mxu1 %v85_v10  ;;  %214 = vmatpush.msra.mxu3 %v84_v11  ;;  %v72_v23 = vld [vmem:[#allocation3 + $0xc0] sm:$0xff]  ;;  %v71_v24 = vld [vmem:[#allocation3 + $0xb8] sm:$0xff]  ;;  %v70_v25 = vld [vmem:[#allocation3 + $0xb0] sm:$0xff] }
   0xe   :  { %146 = vmatpush.msra.mxu2 %v83_v12  ;;  %99 = vmatpush.msra.mxu0 %v84_v11  ;;  %v69_v26 = vld [vmem:[#allocation3 + $0xa8] sm:$0xff]  ;;  %v68_v27 = vld [vmem:[#allocation3 + $0xa0] sm:$0xff]  ;;  %v67_v28 = vld [vmem:[#allocation3 + $0x98] sm:$0xff] }
   0xf   :  { %123 = vmatpush.msra.mxu1 %v82_v13  ;;  %215 = vmatpush.msra.mxu3 %v81_v14  ;;  %v66_v29 = vld [vmem:[#allocation3 + $0x90] sm:$0xff]  ;;  %v65_v30 = vld [vmem:[#allocation3 + $0x88] sm:$0xff]  ;;  %v64_v31 = vld [vmem:[#allocation3 + $0x80] sm:$0xff] }
  0x10   :  { %147 = vmatpush.msra.mxu2 %v80_v15  ;;  %100 = vmatpush.msra.mxu0 %v81_v14  ;;  %v63_v32 = vld [vmem:[#allocation3 + $0x78] sm:$0xff]  ;;  %v62_v33 = vld [vmem:[#allocation3 + $0x70] sm:$0xff]  ;;  %v61_v34 = vld [vmem:[#allocation3 + $0x68] sm:$0xff] }
  0x11   :  { %124 = vmatpush.msra.mxu1 %v79_v16  ;;  %216 = vmatpush.msra.mxu3 %v78_v17  ;;  %v60_v35 = vld [vmem:[#allocation3 + $0x60] sm:$0xff]  ;;  %v59_v36 = vld [vmem:[#allocation3 + $0x58] sm:$0xff]  ;;  %v58_v37 = vld [vmem:[#allocation3 + $0x50] sm:$0xff] }
  0x12   :  { %148 = vmatpush.msra.mxu2 %v77_v18  ;;  %101 = vmatpush.msra.mxu0 %v78_v17  ;;  %v57_v38 = vld [vmem:[#allocation3 + $0x48] sm:$0xff]  ;;  %v56_v39 = vld [vmem:[#allocation3 + $0x40] sm:$0xff]  ;;  %v55_v40 = vld [vmem:[#allocation3 + $0x38] sm:$0xff] }
  0x13   :  { %125 = vmatpush.msra.mxu1 %v76_v19  ;;  %217 = vmatpush.msra.mxu3 %v75_v20  ;;  %v54_v41 = vld [vmem:[#allocation3 + $0x30] sm:$0xff]  ;;  %v53_v42 = vld [vmem:[#allocation3 + $0x28] sm:$0xff]  ;;  %v52_v43 = vld [vmem:[#allocation3 + $0x20] sm:$0xff] }
  0x14   :  { %149 = vmatpush.msra.mxu2 %v74_v21  ;;  %102 = vmatpush.msra.mxu0 %v75_v20  ;;  %v51_v44 = vld [vmem:[#allocation3 + $0x18] sm:$0xff]  ;;  %v50_v45 = vld [vmem:[#allocation3 + $0x10] sm:$0xff]  ;;  %v46_v46 = vld [vmem:[%s309_s0] sm:$0xff] }
  0x15   :  { %126 = vmatpush.msra.mxu1 %v73_v22  ;;  %218 = vmatpush.msra.mxu3 %v72_v23  ;;  %v49_v47 = vld [vmem:[#allocation3 + $0x8] sm:$0xff]  ;;  %v48_v48 = vld [vmem:[#allocation3] sm:$0xff] }
  0x16   :  { %150 = vmatpush.msra.mxu2 %v71_v24  ;;  %103 = vmatpush.msra.mxu0 %v72_v23  ;;  %v47_v49 = vld [vmem:[%s309_s0 + $0x8] sm:$0xff]  ;;  %v186_v50 = vld [vmem:[%s311_s2] sm:$0x7] }
  0x17   :  { %127 = vmatpush.msra.mxu1 %v70_v25  ;;  %219 = vmatpush.msra.mxu3 %v69_v26  ;;  %v189_v51 = vperm.slane %v186_v50, 1  ;;  %v188_v52 = vperm.slane %v186_v50, 0  ;;  %v190_v55 = vperm.slane %v186_v50, 2 }
  0x18   :  { %151 = vmatpush.msra.mxu2 %v68_v27  ;;  %104 = vmatpush.msra.mxu0 %v69_v26 }
  0x19   :  { %128 = vmatpush.msra.mxu1 %v67_v28  ;;  %220 = vmatpush.msra.mxu3 %v66_v29 }
  0x1a   :  { %152 = vmatpush.msra.mxu2 %v65_v30  ;;  %105 = vmatpush.msra.mxu0 %v66_v29 }
  0x1b   :  { %129 = vmatpush.msra.mxu1 %v64_v31  ;;  %221 = vmatpush.msra.mxu3 %v63_v32 }
  0x1c   :  { %153 = vmatpush.msra.mxu2 %v62_v33  ;;  %106 = vmatpush.msra.mxu0 %v63_v32 }
  0x1d   :  { %130 = vmatpush.msra.mxu1 %v61_v34  ;;  %222 = vmatpush.msra.mxu3 %v60_v35 }
  0x1e   :  { %154 = vmatpush.msra.mxu2 %v59_v36  ;;  %107 = vmatpush.msra.mxu0 %v60_v35 }
  0x1f   :  { %131 = vmatpush.msra.mxu1 %v58_v37  ;;  %223 = vmatpush.msra.mxu3 %v57_v38 }
  0x20   :  { %155 = vmatpush.msra.mxu2 %v56_v39  ;;  %108 = vmatpush.msra.mxu0 %v57_v38 }
  0x21   :  { %132 = vmatpush.msra.mxu1 %v55_v40  ;;  %224 = vmatpush.msra.mxu3 %v54_v41 }
  0x22   :  { %156 = vmatpush.msra.mxu2 %v53_v42  ;;  %109 = vmatpush.msra.mxu0 %v54_v41 }
  0x23   :  { %133 = vmatpush.msra.mxu1 %v52_v43  ;;  %225 = vmatpush.msra.mxu3 %v51_v44 }
  0x24   :  { %157 = vmatpush.msra.mxu2 %v50_v45  ;;  %110 = vmatpush.msra.mxu0 %v51_v44 }
  0x25   :  { %158 = vmatmul.f32.vlgmr.msra.gmra.mxu2 %v46_v46  ;;  %134 = vmatpush.msra.mxu1 %v49_v47 }
  0x26   :  { %135 = vmatmul.f32.vlgmr.msra.gmra.mxu1 %v46_v46  ;;  %226 = vmatpush.msra.mxu3 %v48_v48 }
  0x27   :  { %115 = vmatmul.f32.vlgmr.msra.gmra.mxu3 %v47_v49  ;;  %111 = vmatpush.msra.mxu0 %v48_v48 }
  0x28   :  { %112 = vmatmul.f32.vlgmr.msra.gmra.mxu0 %v46_v46 }
  0x2d   :  { %161 = vmatmul.f32.gmra.mxu2 %v47_v49 }
  0x2e   :  { %138 = vmatmul.f32.gmra.mxu1 %v47_v49 }
  0xa3   :  { %v136_v53 = vpop.f32.mrf.mxu1 }
  0xa4   :  { %v195_v54 = vadd.f32 %v189_v51, %v136_v53 }
  0xa5   :  { %v113_v56 = vpop.f32.mrf.mxu0 }
  0xa6   :  { %201 = vst [vmem:[%s312_s3 + $0x8] sm:$0xff] %v195_v54  ;;  %v194_v57 = vadd.f32 %v188_v52, %v113_v56 }
  0xa8   :  { %v159_v58 = vpop.f32.mrf.mxu2  ;;  %200 = vst [vmem:[%s312_s3] sm:$0xff] %v194_v57 }
  0xa9   :  { %v196_v59 = vadd.f32 %v190_v55, %v159_v58 }
  0xaa   :  { %v116_v60 = vpop.f32.mrf.mxu3 }
  0xab   :  { %202 = vst [vmem:[%s312_s3 + $0x10] sm:$0xff] %v196_v59  ;;  %v197_v61 = vadd.f32 %v188_v52, %v116_v60  ;;  %v139_v62 = vpop.f32.mrf.mxu1 }
  0xac   :  { %v198_v63 = vadd.f32 %v189_v51, %v139_v62 }
  0xad   :  { %203 = vst [vmem:[%s312_s3 + $0x18] sm:$0xff] %v197_v61 }
  0xae   :  { %204 = vst [vmem:[%s312_s3 + $0x20] sm:$0xff] %v198_v63 }
  0xb0   :  { %v162_v0 = vpop.f32.mrf.mxu2 }
  0xb1   :  { %v199_v1 = vadd.f32 %v190_v55, %v162_v0 }
  0xb3   :  { %205 = vst [vmem:[%s312_s3 + $0x28] sm:$0xff] %v199_v1 }
  0xb4   :  { %210 = vsyncpa [#allocation4], 1 }

// kernel: transformer_block_forward.6
= control target key start
LH: loop header
LB: loop body
LE: loop exit
PB: predicated region body
PF: predicated region fallthrough
CT: control target
= control target key end

     0   :  { %10 = vsyncpa [#allocation3], 0  ;;  %s1107_s0 = inlined_call_operand.vmem [shape: f32[2,8,384], index: 0, kind: input, shape index: {}, may-alias: {0,1,2}]   ;;  %s1108_s1 = inlined_call_operand.vmem [shape: f32[2,8,384], index: 1, kind: input, shape index: {}, may-alias: {0,1,2}]   ;;  %s1109_s2 = inlined_call_operand.vmem [shape: f32[2,8,384], index: 2, kind: input, shape index: {}, may-alias: {0,1,2}]   ;;  %s1110_s3 = inlined_call_operand.vmem [shape: f32[2,8,128], index: 3, kind: output, shape index: {0}]   ;;  %s1111_s4 = inlined_call_operand.hbm [shape: f32[2,8,8], index: 4, kind: output, shape index: {1}]  }
   0x1   :  { %12 = vsyncpa [#allocation3 + $0x1], 0  ;;  %s955_s15 = smov 0   ;;  %s957_s16 = smov 0  }
   0x2   :  { %s959_s17 = smov 0   ;;  %s961_s18 = smov 0  }
   0x3   :  { %s963_s19 = smov 0   ;;  %s965_s20 = smov 0  }
   0x4 LB: > { %s744_s21 = sadd.s32 4294967295, %s925_s20   ;;  %s745_s22 = sadd.s32 4294967294, %s925_s20   ;;  %s925_s20 = sphi %s965_s20, %s18_s20   ;;  %s921_s19 = sphi %s963_s19, %s1122_s19   ;;  %s917_s18 = sphi %s961_s18, %s1121_s18   ;;  %s913_s17 = sphi %s959_s17, %s1120_s17   ;;  %s909_s16 = sphi %s957_s16, %s1119_s16   ;;  %s905_s15 = sphi %s955_s15, %s1118_s15  }
   0x5   : > { %s30_s23 = sadd.s32 1, %s921_s19  ;;  %s147_s24 = sadd.s32 1, %s913_s17 }
   0x6   : > { %p32_p0 = scmp.ge.s32.totalorder %s30_s23, 2  ;;  %p157_p1 = scmp.ne.s32.totalorder %s913_s17, %s909_s16 }
   0x7   : > { %p158_p2 = scmp.eq.s32.totalorder %s744_s21, 1  ;;  %p163_p3 = scmp.ne.s32.totalorder %s909_s16, %s905_s15 }
   0x8   : > { %s1124_s23 = smov (%p32_p0, %s30_s23), 0  ;;  %p164_p5 = scmp.eq.s32.totalorder %s745_s22, 1 }
   0x9   : > { %p995_p4 = por %p158_p2, %p157_p1  ;;  %s142_s26 = ssub.s32 %s921_s19, %s1124_s23 }
   0xa   : > { %p748_p6 = scmp.ge.s32.totalorder %s925_s20, 1  ;;  %p145_p7 = scmp.eq.s32.totalorder %s142_s26, 0 }
   0xb   : > { %p1002_p8 = por %p164_p5, %p163_p3  ;;  %p212_p9 = scmp.lt.s32.totalorder %s925_s20, 3 }
   0xc   : > { %s1008_s28 = scalar_select %p145_p7, %s913_s17, %s147_s24  }
   0xd   : > { %p213_p10 = pnand %p748_p6, %p212_p9 }
   0xe   : > { %p261_p11 = scmp.lt.s32.totalorder (!%p213_p10), %s917_s18, 1  ;;  %s1113_s11 = smov (!%p213_p10), 96  }
   0xf   : > { %216 = sbr.rel (%p213_p10) target bundleno = 1049 (0x419), region = 32  ;;  %s1112_s12 = smov (!%p213_p10), 64  }
  0x10   : > { %s929_s13 = smov (!%p213_p10), 32   ;;  %s258_s24 = sand.u32 (!%p213_p10), 1, %s909_s16  }
  0x11   : > { %s749_s26 = sshll.u32 (!%p213_p10), %s258_s24, 3  ;;  %s769_s5 = sshll.u32 (!%p213_p10), %s917_s18, 3 }
  0x12   : > { %s595_s8 = scalar_lea.hbm (!%p213_p10), %s1111_s4, %s769_s5  ;;  %s581_s14 = scalar_lea.sflag (!%p213_p10), [#allocation3], %s258_s24 }
  0x14   : > { %s1012_s29 = scalar_select %p261_p11, %s917_s18, 1  ;;  %vm292_vm0 = vcmask 261120   ;;  %vm319_vm1 = vcmask 64512  }
  0x15   : > { %s867_s18 = scalar_lea.hbm %s1111_s4, 16 }
  0x16   : > { %s1015_s30 = smul.u32 24, %s1012_s29 }
  0x18   : > { %s670_s7 = scalar_lea.vmem %s1108_s1, %s1015_s30  ;;  %s269_s10 = scalar_lea.vmem %s1107_s0, %s1015_s30 }
  0x19   : > { %v754_v0 = vld [vmem:[%s670_s7 + $0x8] sm:$0xff]  ;;  %v289_v1 = vld [vmem:[%s269_s10] sm:$0xff]  ;;  %s674_s22 = scalar_lea.vmem %s1109_s2, %s1015_s30  ;;  %s260_s30 = scalar_lea.vmem [#allocation2], %s749_s26 }
  0x1a   : > { %356 = vrot.lane.b32.xlu1 %v754_v0, %s1113_s11  ;;  %756 = vmatpush.xpose.msk.msra.mxu0 %vm292_vm0, %v754_v0  ;;  %v755_v18 = vld [vmem:[%s674_s22 + $0x10] sm:$0xff]  ;;  %s597_s9 = sshll.u32 %s260_s30, 4  ;;  %s599_s10 = sshll.u32 %s595_s8, 4  ;;  %s598_s9 = int_to_ptr.vmem [resolvable:$true] %s597_s9  ;;  %s600_s10 = int_to_ptr.hbm [resolvable:$true] %s599_s10 }
  0x1b   : > { %423 = vrot.lane.b32.xlu2 %v754_v0, %s1112_s12  ;;  %349 = vmatpush.msra.mxu1 %v755_v18  ;;  %s861_s21 = sshra.s32 %s600_s10, 4  ;;  %s862_s21 = int_to_ptr.hbm [resolvable:$true] %s861_s21 }
  0x1c   : > { %s863_s22 = scalar_lea.hbm %s862_s21, 8  ;;  %p868_p1 = scmp.lt.s32.totalorder %s862_s21, %s1111_s4 }
  0x1d   : > { %757 = vmatmul.msk.f32.vlgmr.msra.gmra.mxu0 %vm292_vm0, %v289_v1  ;;  %p864_p12 = scmp.ne.s32.totalorder %s862_s21, %s863_s22  ;;  %p869_p2 = scmp.lt.s32.totalorder %s867_s18, %s863_s22 }
  0x1f   : > { %p865_p13 = pnand %p864_p12, %p995_p4  ;;  %p870_p3 = por %p869_p2, %p868_p1 }
  0x21   : > { %p866_p0 = pneg %p865_p13 }
  0x22   : > { %354 = vrot.lane.b32.xlu1 %v289_v1, %s1113_s11 }
  0x23   : > { %489 = vrot.lane.b32.xlu2 %v754_v0, %s929_s13  ;;  %p871_p5 = pnand %p870_p3, %p866_p0 }
  0x2a   : > { %487 = vrot.lane.b32.xlu1 %v289_v1, %s929_s13 }
  0x75   : > { %v424_v2 = vpop.permute.xlu2 %423 }
  0x76   : > { %762 = vmatpush.xpose.msk.msrb.mxu1 %vm292_vm0, %v424_v2 }
  0x7d   : > { %v490_v3 = vpop.permute.xlu2 %489 }
  0x7e   : > { %765 = vmatpush.xpose.msk.msrb.mxu0 %vm292_vm0, %v490_v3 }
  0x8c   : > { %v357_v4 = vpop.permute.xlu1 %356 }
  0x8d   : > { %759 = vmatpush.xpose.msk.msra.mxu2 %vm292_vm0, %v357_v4 }
  0x94   : > { %v355_v5 = vpop.permute.xlu1 %354 }
  0x95   : > { %760 = vmatmul.msk.f32.vlgmr.msra.gmra.mxu2 %vm292_vm0, %v355_v5 }
  0x9a   : > { %v316_v6 = vpop.f32.mrf.mxu0 }
  0x9b   : > { %v320_v7 = vsel %vm319_vm1, %v316_v6, -inf }
  0x9c   : > { %321 = vmax.xlane.f32.xlu0 %v320_v7  ;;  %v488_v8 = vpop.permute.xlu1 %487 }
  0x9d   : > { %766 = vmatmul.msk.f32.vlgmr.msrb.gmra.mxu0 %vm292_vm0, %v488_v8 }
 0x10f   : > { %v322_v9 = vpop.xlane.xlu0 %321 }
 0x110   : > { %v323_v10 = vsub.f32 %v316_v6, %v322_v9 }
 0x112   : > { %v324_v11 = vmul.f32 1.442695, %v323_v10 }
 0x114   : > { %831 = vpow2.f32 %v324_v11 }
 0x118   : > { %v379_v12 = vpop.f32.mrf.mxu2 }
 0x119   : > { %v382_v13 = vsel %vm319_vm1, %v379_v12, -inf }
 0x11a   : > { %v832_v14 = vpop.eup %831  ;;  %383 = vmax.xlane.f32.xlu2 %v382_v13  ;;  %v512_v16 = vpop.f32.mrf.mxu0 }
 0x11b   : > { %v326_v15 = vsel %vm319_vm1, %v832_v14, 0.0  ;;  %v515_v17 = vsel %vm319_vm1, %v512_v16, -inf }
 0x11c   : > { %327 = vadd.xlane.f32.xlu0 %v326_v15 }
 0x130   : > { %421 = vrot.lane.b32.xlu0 %v289_v1, %s1112_s12 }
 0x15a   : > { %516 = vmax.xlane.f32.xlu0 %v515_v17 }
 0x16e   : > { %460 = vrot.lane.b32.xlu0 %v755_v18, %s1112_s12 }
 0x18d   : > { %v384_v19 = vpop.xlane.xlu2 %383 }
 0x18e   : > { %v385_v20 = vsub.f32 %v379_v12, %v384_v19 }
 0x18f   : > { %v328_v21 = vpop.xlane.xlu0 %327 }
 0x190   : > { %v386_v22 = vmul.f32 1.442695, %v385_v20  ;;  %833 = vrcp.f32 %v328_v21 }
 0x192   : > { %835 = vpow2.f32 %v386_v22 }
 0x196   : > { %v834_v23 = vpop.eup %833 }
 0x197   : > { %v330_v24 = vmul.f32 %v834_v23, %v832_v14 }
 0x198   : > { %v836_v25 = vpop.eup %835 }
 0x199   : > { %758 = vmatmul.msk.f32.vlgmr.msra.gmra.mxu1 %vm319_vm1, %v330_v24  ;;  %v388_v26 = vsel %vm319_vm1, %v836_v25, 0.0 }
 0x19a   : > { %389 = vadd.xlane.f32.xlu2 %v388_v26 }
 0x1a2   : > { %v422_v27 = vpop.permute.xlu0 %421 }
 0x1a3   : > { %763 = vmatmul.msk.f32.vlgmr.msrb.gmra.mxu1 %vm292_vm0, %v422_v27 }
 0x1cd   : > { %v517_v28 = vpop.xlane.xlu0 %516 }
 0x1ce   : > { %v518_v29 = vsub.f32 %v512_v16, %v517_v28 }
 0x1d0   : > { %v519_v30 = vmul.f32 1.442695, %v518_v29 }
 0x1d2   : > { %837 = vpow2.f32 %v519_v30 }
 0x1d8   : > { %v838_v31 = vpop.eup %837 }
 0x1d9   : > { %v521_v32 = vsel %vm319_vm1, %v838_v31, 0.0 }
 0x1da   : > { %522 = vadd.xlane.f32.xlu2 %v521_v32 }
 0x1e0   : > { %v461_v45 = vpop.permute.xlu0 %460 }
 0x20d   : > { %v390_v40 = vpop.xlane.xlu2 %389 }
 0x216   : > { %v1051_v33 = vpop.f32.mrf.mxu1 }
 0x220   : > { %v446_v34 = vpop.f32.mrf.mxu1 }
 0x221   : > { %v449_v35 = vsel %vm319_vm1, %v446_v34, -inf }
 0x222   : > { %450 = vmax.xlane.f32.xlu1 %v449_v35 }
 0x23b   : > { %394 = vrot.lane.b32.xlu1 %v755_v18, %s1113_s11 }
 0x24d   : > { %v523_v46 = vpop.xlane.xlu2 %522 }
 0x295   : > { %v451_v36 = vpop.xlane.xlu1 %450 }
 0x296   : > { %v452_v37 = vsub.f32 %v446_v34, %v451_v36 }
 0x298   : > { %v453_v38 = vmul.f32 1.442695, %v452_v37 }
 0x29a   : > { %839 = vpow2.f32 %v453_v38 }
 0x29b   : > { %841 = vrcp.f32 %v390_v40 }
 0x29c   : > { %843 = vrcp.f32 %v523_v46 }
 0x2a0   : > { %v840_v39 = vpop.eup %839 }
 0x2a1   : > { %v455_v41 = vsel %vm319_vm1, %v840_v39, 0.0  ;;  %v842_v42 = vpop.eup %841 }
 0x2a2   : > { %456 = vadd.xlane.f32.xlu2 %v455_v41  ;;  %v392_v44 = vmul.f32 %v842_v42, %v836_v25  ;;  %v844_v48 = vpop.eup %843 }
 0x2a3   : > { %v525_v53 = vmul.f32 %v844_v48, %v838_v31 }
 0x2a4   : > { %v420_v50 = vadd.f32 %v392_v44, %v330_v24 }
 0x2ad   : > { %v395_v43 = vpop.permute.xlu1 %394 }
 0x2ae   : > { %415 = vmatpush.msra.mxu3 %v395_v43 }
 0x2af   : > { %761 = vmatmul.msk.f32.vlgmr.msra.gmra.mxu3 %vm319_vm1, %v392_v44 }
 0x2b0   : > { %481 = vmatpush.msrb.mxu3 %v461_v45 }
 0x2ba   : > { %526 = vrot.lane.b32.xlu2 %v755_v18, %s929_s13 }
 0x315   : > { %v457_v47 = vpop.xlane.xlu2 %456 }
 0x316   : > { %845 = vrcp.f32 %v457_v47 }
 0x31c   : > { %v846_v49 = vpop.eup %845 }
 0x31d   : > { %v527_v51 = vpop.permute.xlu2 %526  ;;  %v459_v52 = vmul.f32 %v846_v49, %v840_v39 }
 0x31e   : > { %547 = vmatpush.msrb.mxu2 %v527_v51 }
 0x31f   : > { %764 = vmatmul.msk.f32.vlgmr.msrb.gmra.mxu3 %vm319_vm1, %v459_v52  ;;  %v486_v54 = vadd.f32 %v459_v52, %v420_v50  ;;  %767 = vmatmul.msk.f32.vlgmr.msrb.gmra.mxu2 %vm319_vm1, %v525_v53 }
 0x321   : > { %v552_v55 = vadd.f32 %v525_v53, %v486_v54 }
 0x323   : > { %v571_v56 = vmul.f32 0.25, %v552_v55 }
 0x325   : > { %572 = vst.msk [vmem:[%s260_s30] sm:$0xff] %vm319_vm1, %v571_v56 }
 0x332   : > { %v417_v57 = vpop.f32.mrf.mxu3 }
 0x333   : > { %554 = vrot.lane.b32.xlu1 %v417_v57, %s929_s13 }
 0x334   : > { %874 = shalt.err (!%p871_p5)
}
 0x335   : > { %773 = dma.vmem_to_hbm [thread:$0]  (%p995_p4), %s598_s9, 128, %s600_s10, %s581_s14   ;;  %vm566_vm2 = vcmask 523264   ;;  %vm568_vm3 = vcmask 785408  }
 0x336   : > { %s1116_s24 = smov 96   ;;  %s1117_s30 = smov 64  }
 0x337   : > { %s753_s12 = sshll.u32 %s1012_s29, 3 }
 0x338   : > { %s288_s25 = scalar_lea.vmem %s1110_s3, %s753_s12 }
 0x3a2   : > { %v483_v58 = vpop.f32.mrf.mxu3  ;;  %v549_v59 = vpop.f32.mrf.mxu2 }
 0x3a3   : > { %562 = vrot.lane.b32.xlu1 %v549_v59, %s1116_s24  ;;  %558 = vrot.lane.b32.xlu0 %v483_v58, %s1117_s30 }
 0x3a5   : > { %v555_v60 = vpop.permute.xlu1 %554 }
 0x3a6   : > { %v565_v61 = vsel %vm292_vm0, %v1051_v33, %v555_v60 }
 0x415   : > { %v563_v62 = vpop.permute.xlu1 %562  ;;  %v559_v63 = vpop.permute.xlu0 %558 }
 0x416   : > { %v567_v0 = vsel %vm566_vm2, %v565_v61, %v559_v63 }
 0x417   : > { %v569_v1 = vsel %vm568_vm3, %v567_v0, %v563_v62 }
 0x418   : > { %570 = vst [vmem:[%s288_s25] sm:$0xff] %v569_v1 }
 0x419 PF: > { %p779_p4 = scmp.ge.s32.totalorder %s925_s20, 2  ;;  %s621_s29 = sand.u32 1, %s905_s15  }
 0x41a   : > { %s622_s6 = scalar_lea.sflag [#allocation3], %s621_s29 }
 0x41b   : > { %p776_p6 = pnand %p779_p4, %p1002_p8 }
 0x41d   : > { %p777_p7 = pneg %p776_p6 }
 0x41f   : > { %900 = dma.done.wait (%p777_p7), %s622_s6, 128  }
 0x420   : > { %902 = vsyncadd (%p777_p7), %s622_s6, 4294967168  ;;  %s18_s20 = sadd.s32 1, %s925_s20   ;;  %s1118_s15 = smov %s909_s16 }
 0x421   : > { %p15_p9 = scmp.ge.s32.totalorder %s18_s20, 4   ;;  %s1119_s16 = smov %s913_s17 }
 0x422   : > { %s1120_s17 = smov %s1008_s28  ;;  %s1121_s18 = smov %s921_s19 }
 0x423   : > { %s1122_s19 = smov %s1124_s23  ;;  %17 = sbr.rel (!%p15_p9) target bundleno = 4 (0x4), region = 85 }
 0x428   :  { %628 = vsyncpa [#allocation3], 1 }
 0x429   :  { %630 = vsyncpa [#allocation3 + $0x1], 1 }

// kernel: transformer_block_forward.7
= control target key start
LH: loop header
LB: loop body
LE: loop exit
PB: predicated region body
PF: predicated region fallthrough
CT: control target
= control target key end

     0   :  { %11 = vsyncpa [#allocation4], 0  ;;  %s228_s24 = smov [#allocation3]   ;;  %s229_s26 = smov 128   ;;  %s297_s0 = inlined_call_operand.vmem [shape: f32[16,128], index: 0, kind: input, shape index: {}]   ;;  %s298_s1 = inlined_call_operand.hbm [shape: f32[128,128], index: 1, kind: input, shape index: {}]   ;;  %s299_s2 = inlined_call_operand.vmem [shape: f32[1,128], index: 2, kind: input, shape index: {}]   ;;  %s300_s3 = inlined_call_operand.vmem [shape: f32[16,128], index: 3, kind: input, shape index: {}]   ;;  %s301_s4 = inlined_call_operand.vmem [shape: f32[1,128], index: 4, kind: input, shape index: {}]   ;;  %s302_s5 = inlined_call_operand.vmem [shape: f32[1,128], index: 5, kind: input, shape index: {}]   ;;  %s303_s6 = inlined_call_operand.vmem [shape: f32[16,128], index: 6, kind: output, shape index: {}]  }
   0x1   :  { %s18_s23 = sshll.u32 %s298_s1, 4  ;;  %s20_s25 = sshll.u32 %s228_s24, 4  ;;  %s19_s23 = int_to_ptr.hbm [resolvable:$true] %s18_s23  ;;  %s21_s25 = int_to_ptr.vmem [resolvable:$true] %s20_s25 }
   0x2   :  { %s230_s27 = smov 8  }
   0x3   :  { %26 = dma.hbm_to_vmem [thread:$0]  %s19_s23, 2048, %s21_s25, [#allocation4], %s229_s26, %s229_s26, %s230_s27  }
   0x4   :  { %226 = dma.done.wait [#allocation4], 2048  }
   0x5   :  { %227 = vsyncadd [#allocation4], 4294965248  ;;  %v64_v0 = vld [vmem:[#allocation3 + $0x78] sm:$0xff]  ;;  %v63_v1 = vld [vmem:[#allocation3 + $0x70] sm:$0xff]  ;;  %v231_v27 = vmov 128.0  }
   0x6   :  { %65 = vmatpush.msra.mxu0 %v64_v0  ;;  %173 = vmatpush.msra.mxu1 %v64_v0  ;;  %v62_v2 = vld [vmem:[#allocation3 + $0x68] sm:$0xff]  ;;  %v61_v3 = vld [vmem:[#allocation3 + $0x60] sm:$0xff]  ;;  %v60_v4 = vld [vmem:[#allocation3 + $0x58] sm:$0xff]  ;;  %196 = vrcp.f32 %v231_v27 }
   0x7   :  { %v59_v5 = vld [vmem:[#allocation3 + $0x50] sm:$0xff]  ;;  %v58_v6 = vld [vmem:[#allocation3 + $0x48] sm:$0xff]  ;;  %v57_v7 = vld [vmem:[#allocation3 + $0x40] sm:$0xff] }
   0x8   :  { %66 = vmatpush.msra.mxu0 %v63_v1  ;;  %174 = vmatpush.msra.mxu1 %v63_v1  ;;  %v56_v8 = vld [vmem:[#allocation3 + $0x38] sm:$0xff]  ;;  %v55_v9 = vld [vmem:[#allocation3 + $0x30] sm:$0xff]  ;;  %v54_v10 = vld [vmem:[#allocation3 + $0x28] sm:$0xff] }
   0x9   :  { %v53_v11 = vld [vmem:[#allocation3 + $0x20] sm:$0xff]  ;;  %v52_v12 = vld [vmem:[#allocation3 + $0x18] sm:$0xff]  ;;  %v51_v13 = vld [vmem:[#allocation3 + $0x10] sm:$0xff] }
   0xa   :  { %67 = vmatpush.msra.mxu0 %v62_v2  ;;  %175 = vmatpush.msra.mxu1 %v62_v2  ;;  %v50_v14 = vld [vmem:[#allocation3 + $0x8] sm:$0xff]  ;;  %v49_v15 = vld [vmem:[#allocation3] sm:$0xff] }
   0xb   :  { %v47_v16 = vld [vmem:[%s297_s0] sm:$0xff]  ;;  %v48_v17 = vld [vmem:[%s297_s0 + $0x8] sm:$0xff] }
   0xc   :  { %68 = vmatpush.msra.mxu0 %v61_v3  ;;  %176 = vmatpush.msra.mxu1 %v61_v3  ;;  %v193_v18 = vld [vmem:[%s299_s2] ss:$0 sm:$0xff]  ;;  %v104_v25 = vld [vmem:[%s300_s3 + $0x8] sm:$0xff]  ;;  %v197_v28 = vpop.eup %196 }
   0xd   :  { %v103_v20 = vld [vmem:[%s300_s3] sm:$0xff]  ;;  %v112_v29 = vmul.f32 128.0, %v197_v28  ;;  %vm116_vm0 = vweird.f32 %v197_v28 }
   0xe   :  { %69 = vmatpush.msra.mxu0 %v60_v4  ;;  %177 = vmatpush.msra.mxu1 %v60_v4  ;;  %v194_v56 = vld [vmem:[%s301_s4] ss:$0 sm:$0xff] }
   0xf   :  { %v113_v30 = vsub.f32 1.0, %v112_v29  ;;  %v195_v59 = vld [vmem:[%s302_s5] ss:$0 sm:$0xff] }
  0x10   :  { %70 = vmatpush.msra.mxu0 %v59_v5  ;;  %178 = vmatpush.msra.mxu1 %v59_v5 }
  0x11   :  { %v114_v31 = vmul.f32 %v197_v28, %v113_v30 }
  0x12   :  { %71 = vmatpush.msra.mxu0 %v58_v6  ;;  %179 = vmatpush.msra.mxu1 %v58_v6 }
  0x13   :  { %v115_v32 = vadd.f32 %v197_v28, %v114_v31 }
  0x14   :  { %72 = vmatpush.msra.mxu0 %v57_v7  ;;  %180 = vmatpush.msra.mxu1 %v57_v7 }
  0x15   :  { %v117_v33 = vsel %vm116_vm0, %v197_v28, %v115_v32 }
  0x16   :  { %73 = vmatpush.msra.mxu0 %v56_v8  ;;  %181 = vmatpush.msra.mxu1 %v56_v8 }
  0x18   :  { %74 = vmatpush.msra.mxu0 %v55_v9  ;;  %182 = vmatpush.msra.mxu1 %v55_v9 }
  0x1a   :  { %75 = vmatpush.msra.mxu0 %v54_v10  ;;  %183 = vmatpush.msra.mxu1 %v54_v10 }
  0x1c   :  { %76 = vmatpush.msra.mxu0 %v53_v11  ;;  %184 = vmatpush.msra.mxu1 %v53_v11 }
  0x1e   :  { %77 = vmatpush.msra.mxu0 %v52_v12  ;;  %185 = vmatpush.msra.mxu1 %v52_v12 }
  0x20   :  { %78 = vmatpush.msra.mxu0 %v51_v13  ;;  %186 = vmatpush.msra.mxu1 %v51_v13 }
  0x22   :  { %79 = vmatpush.msra.mxu0 %v50_v14  ;;  %187 = vmatpush.msra.mxu1 %v50_v14 }
  0x24   :  { %80 = vmatpush.msra.mxu0 %v49_v15  ;;  %188 = vmatpush.msra.mxu1 %v49_v15 }
  0x25   :  { %81 = vmatmul.f32.vlgmr.msra.gmra.mxu0 %v47_v16  ;;  %84 = vmatmul.f32.vlgmr.msra.gmra.mxu1 %v48_v17 }
  0xa2   :  { %v82_v19 = vpop.f32.mrf.mxu0  ;;  %v85_v22 = vpop.f32.mrf.mxu1 }
  0xa3   :  { %v101_v21 = vadd.f32 %v193_v18, %v82_v19  ;;  %v102_v24 = vadd.f32 %v193_v18, %v85_v22 }
  0xa5   :  { %v105_v23 = vadd.f32 %v103_v20, %v101_v21  ;;  %v106_v26 = vadd.f32 %v104_v25, %v102_v24 }
  0xa7   :  { %107 = vadd.xlane.f32.xlu0 %v105_v23 }
  0xaf   :  { %109 = vadd.xlane.f32.xlu0 %v106_v26 }
 0x11a   :  { %v108_v34 = vpop.xlane.xlu0 %107 }
 0x11b   :  { %v118_v35 = vmul.f32 %v117_v33, %v108_v34 }
 0x11d   :  { %v120_v36 = vsub.f32 %v105_v23, %v118_v35 }
 0x11f   :  { %v122_v37 = vmul.f32 %v120_v36, %v120_v36 }
 0x121   :  { %124 = vadd.xlane.f32.xlu1 %v122_v37 }
 0x122   :  { %v110_v38 = vpop.xlane.xlu0 %109 }
 0x123   :  { %v119_v39 = vmul.f32 %v117_v33, %v110_v38 }
 0x125   :  { %v121_v40 = vsub.f32 %v106_v26, %v119_v39 }
 0x127   :  { %v123_v41 = vmul.f32 %v121_v40, %v121_v40 }
 0x129   :  { %126 = vadd.xlane.f32.xlu1 %v123_v41 }
 0x194   :  { %v125_v42 = vpop.xlane.xlu1 %124 }
 0x195   :  { %v128_v43 = vmul.f32 %v125_v42, %v117_v33 }
 0x197   :  { %v130_v44 = vadd.f32 1e-05, %v128_v43 }
 0x199   :  { %198 = vrsqrt.f32 %v130_v44  ;;  %vm138_vm2 = vweird.f32 %v130_v44 }
 0x19c   :  { %v127_v45 = vpop.xlane.xlu1 %126 }
 0x19d   :  { %v129_v46 = vmul.f32 %v127_v45, %v117_v33 }
 0x19f   :  { %v199_v47 = vpop.eup %198  ;;  %v131_v48 = vadd.f32 1e-05, %v129_v46 }
 0x1a0   :  { %v133_v49 = vmul.f32 %v199_v47, %v130_v44  ;;  %vm139_vm1 = vweird.f32 %v199_v47 }
 0x1a1   :  { %200 = vrsqrt.f32 %v131_v48  ;;  %vm140_vm3 = vmor %vm138_vm2, %vm139_vm1  ;;  %vm148_vm5 = vweird.f32 %v131_v48 }
 0x1a2   :  { %v134_v50 = vmul.f32 %v199_v47, %v133_v49 }
 0x1a4   :  { %v135_v51 = vmul.f32 0.5, %v134_v50 }
 0x1a6   :  { %v136_v52 = vsub.f32 1.5, %v135_v51 }
 0x1a7   :  { %v201_v53 = vpop.eup %200 }
 0x1a8   :  { %v137_v54 = vmul.f32 %v199_v47, %v136_v52  ;;  %v143_v55 = vmul.f32 %v201_v53, %v131_v48  ;;  %vm149_vm4 = vweird.f32 %v201_v53 }
 0x1a9   :  { %vm150_vm6 = vmor %vm148_vm5, %vm149_vm4 }
 0x1aa   :  { %v141_v57 = vsel %vm140_vm3, %v199_v47, %v137_v54  ;;  %v144_v58 = vmul.f32 %v201_v53, %v143_v55 }
 0x1ab   :  { %v152_v60 = vmul.f32 %v141_v57, %v120_v36 }
 0x1ac   :  { %v145_v61 = vmul.f32 0.5, %v144_v58 }
 0x1ad   :  { %v158_v62 = vmul.f32 %v194_v56, %v152_v60 }
 0x1ae   :  { %v146_v63 = vsub.f32 1.5, %v145_v61 }
 0x1af   :  { %v164_v0 = vadd.f32 %v195_v59, %v158_v62 }
 0x1b0   :  { %v147_v1 = vmul.f32 %v201_v53, %v146_v63 }
 0x1b1   :  { %166 = vst [vmem:[%s303_s6] sm:$0xff] %v164_v0 }
 0x1b2   :  { %v151_v2 = vsel %vm150_vm6, %v201_v53, %v147_v1 }
 0x1b3   :  { %v153_v3 = vmul.f32 %v151_v2, %v121_v40 }
 0x1b5   :  { %v159_v4 = vmul.f32 %v194_v56, %v153_v3 }
 0x1b7   :  { %v165_v5 = vadd.f32 %v195_v59, %v159_v4 }
 0x1b9   :  { %167 = vst [vmem:[%s303_s6 + $0x8] sm:$0xff] %v165_v5 }
 0x1ba   :  { %172 = vsyncpa [#allocation4], 1 }

</bundles_post_ra>
